<compile_context>
chip_gen: v6e
topology: v6e:2x2x1
jax: 0.10.0
libtpu: 0.0.40
codegen_flags: <defaults>
</compile_context>

<pallas_src>
import functools

import jax
import jax.numpy as jnp
import numpy as np
from jax.experimental import pallas as pl
from jax.experimental.pallas import tpu as pltpu


# ----------------------------------------------------------------------------
# Fused Pallas kernel: conv1 -> pool1 -> conv2 -> pool2 -> classifier
# ----------------------------------------------------------------------------
def _fused_forward_kernel(x_ref, wb1_ref, b1_ref, sel1_ref, wb2_ref, b2_ref,
                          sel2_ref, w1s_ref, fb1_ref, w2p_ref, fb2_ref,
                          feat_ref, logit_ref, s2):
    f32 = jnp.float32
    bf16 = jnp.bfloat16

    # ---- conv1: 3x3 SAME, 3->16, via 3 banded matmuls (K padded 96->128) ----
    acc1 = jnp.zeros((32, 512), f32)
    for dy in range(3):
        lhs = x_ref[dy:dy + 32, :].astype(bf16)                       # (32,128)
        acc1 = acc1 + jnp.dot(lhs, wb1_ref[dy], preferred_element_type=f32)
    a1 = jnp.maximum(acc1 + b1_ref[...], 0.0)                          # (32,512)

    # ---- pool1 (2x2/2): columns pre-split [even-x | odd-x], rows via 0/1
    #      selection matmuls ----
    c1 = jnp.maximum(a1[:, :256], a1[:, 256:])                         # (32,256)
    p1 = jnp.maximum(jnp.dot(sel1_ref[0], c1, preferred_element_type=f32),
                     jnp.dot(sel1_ref[1], c1, preferred_element_type=f32))
    # p1: (16, 256) = (H=16, W=16 * C=16) row layout.

    # ---- stage conv2 input in VMEM scratch with zero H-padding rows ----
    zrow = jnp.zeros((1, 256), f32)
    s2[0:1, :] = zrow
    s2[17:18, :] = zrow
    s2[1:17, :] = p1

    # ---- conv2: 3x3 SAME, 16->16 (K = 256, already lane aligned) ----
    acc2 = jnp.zeros((16, 256), f32)
    for dy in range(3):
        lhs = s2[dy:dy + 16, :].astype(bf16)                           # (16,256)
        acc2 = acc2 + jnp.dot(lhs, wb2_ref[dy], preferred_element_type=f32)
    a2 = jnp.maximum(acc2 + b2_ref[...], 0.0)                          # (16,256)

    # ---- pool2 ----
    c2 = jnp.maximum(a2[:, :128], a2[:, 128:])                         # (16,128)
    p2 = jnp.maximum(jnp.dot(sel2_ref[0], c2, preferred_element_type=f32),
                     jnp.dot(sel2_ref[1], c2, preferred_element_type=f32))
    # p2: (8, 128) = (H=8, W=8 * C=16) pooled features (lane-dense output).
    feat_ref[...] = p2

    # ---- classifier: Linear(1024,256) + ReLU + Dropout(id) + Linear(256,C) --
    # fc1 weights are host-permuted into 8 slabs matching p2's row layout.
    h = fb1_ref[...]                                                   # (1,256)
    for r in range(8):
        h = h + jnp.dot(p2[r:r + 1, :].astype(bf16), w1s_ref[r],
                        preferred_element_type=f32)
    h = jnp.maximum(h, 0.0)
    # nn.Dropout(0.1): identity in inference mode.
    logits = jnp.dot(h.astype(bf16), w2p_ref[...],
                     preferred_element_type=f32) + fb2_ref[...]        # (1,128)
    logit_ref[...] = logits


# ----------------------------------------------------------------------------
# Host-side (one-time) weight preparation
# ----------------------------------------------------------------------------
def _band_conv_weight(w_oihw, width):
    """(Cout,Cin,3,3) conv weight -> (3, width*Cin, width*Cout) banded matrices.

    Row layout of the expected input row is [x*Cin + c]; output columns are
    permuted to [even-x block | odd-x block] so the 2x2 pool's x-reduction is a
    128-aligned lane slice inside the kernel.  Width ("SAME") zero-padding is
    encoded by simply dropping out-of-range taps.
    """
    w = np.asarray(w_oihw, np.float32)
    c_out, c_in = w.shape[0], w.shape[1]
    w_hwio = np.transpose(w, (2, 3, 1, 0))                  # (3, 3, Cin, Cout)
    band = np.zeros((3, width * c_in, width * c_out), np.float32)
    half = (width // 2) * c_out
    for x in range(width):
        oc = (x % 2) * half + (x // 2) * c_out
        for dx in range(3):
            xi = x + dx - 1
            if 0 <= xi < width:
                band[:, xi * c_in:(xi + 1) * c_in, oc:oc + c_out] = w_hwio[:, dx]
    return band


def _pool_row_select(h):
    """0/1 matrices selecting even / odd rows: shape (2, h//2, h)."""
    idx = np.arange(h // 2)
    sel = np.zeros((2, h // 2, h), np.float32)
    sel[0, idx, 2 * idx] = 1.0
    sel[1, idx, 2 * idx + 1] = 1.0
    return sel


def prepare_params(params, num_classes=10):
    """One-time host precompute: banded conv weights, pool selectors, permuted
    and padded FC weights.  Matmul weights are cast to bf16."""
    band1 = _band_conv_weight(params["conv1_w"], 32)         # (3, 96, 512)
    band1 = np.pad(band1, ((0, 0), (0, 32), (0, 0)))         # K 96 -> 128
    band2 = _band_conv_weight(params["conv2_w"], 16)         # (3, 256, 256)

    b1r = np.tile(np.asarray(params["conv1_b"], np.float32), 32).reshape(1, 512)
    b2r = np.tile(np.asarray(params["conv2_b"], np.float32), 16).reshape(1, 256)

    # fc1: (1024, 256) with NCHW flatten index c*64 + y*8 + x  ->  slabs
    # (8, 128, 256) matching the kernel's (y, x*16 + c) feature layout.
    w1 = np.asarray(params["fc1_w"], np.float32)
    w1s = w1.reshape(16, 8, 8, 256).transpose(1, 2, 0, 3).reshape(8, 128, 256)
    fb1 = np.asarray(params["fc1_b"], np.float32).reshape(1, 256)

    # fc2: pad the class dim 10 -> 128 so the logits store is lane-dense.
    w2 = np.asarray(params["fc2_w"], np.float32)
    w2p = np.zeros((256, 128), np.float32)
    w2p[:, :num_classes] = w2
    fb2 = np.zeros((1, 128), np.float32)
    fb2[0, :num_classes] = np.asarray(params["fc2_b"], np.float32)

    return {
        "wb1": jnp.asarray(band1, jnp.bfloat16),
        "b1r": jnp.asarray(b1r),
        "sel1": jnp.asarray(_pool_row_select(32)),
        "wb2": jnp.asarray(band2, jnp.bfloat16),
        "b2r": jnp.asarray(b2r),
        "sel2": jnp.asarray(_pool_row_select(16)),
        "w1s": jnp.asarray(w1s, jnp.bfloat16),
        "fb1": jnp.asarray(fb1),
        "w2p": jnp.asarray(w2p, jnp.bfloat16),
        "fb2": jnp.asarray(fb2),
    }


# ----------------------------------------------------------------------------
# Forward pass
# ----------------------------------------------------------------------------
def forward(x_nchw, prep, *, num_classes):
    """Returns (logits, flattened_conv_output), matching the PyTorch module."""
    B = x_nchw.shape[0]
    assert x_nchw.shape[1:] == (3, 32, 32)

    # NCHW -> (B, H+2, W*Cin) row layout, H zero-padded, K padded 96 -> 128.
    xr = jnp.transpose(x_nchw, (0, 2, 3, 1)).reshape(B, 32, 96)
    xr = jnp.pad(xr, ((0, 0), (1, 1), (0, 32)))              # (B, 34, 128)

    feat, logits_pad = pl.pallas_call(
        _fused_forward_kernel,
        out_shape=(jax.ShapeDtypeStruct((B, 8, 128), jnp.float32),
                   jax.ShapeDtypeStruct((B, 1, 128), jnp.float32)),
        grid=(B,),
        in_specs=[
            pl.BlockSpec((None, 34, 128), lambda b: (b, 0, 0)),   # image
            pl.BlockSpec((3, 128, 512), lambda b: (0, 0, 0)),     # conv1 band
            pl.BlockSpec((1, 512), lambda b: (0, 0)),             # conv1 bias
            pl.BlockSpec((2, 16, 32), lambda b: (0, 0, 0)),       # pool1 select
            pl.BlockSpec((3, 256, 256), lambda b: (0, 0, 0)),     # conv2 band
            pl.BlockSpec((1, 256), lambda b: (0, 0)),             # conv2 bias
            pl.BlockSpec((2, 8, 16), lambda b: (0, 0, 0)),        # pool2 select
            pl.BlockSpec((8, 128, 256), lambda b: (0, 0, 0)),     # fc1 slabs
            pl.BlockSpec((1, 256), lambda b: (0, 0)),             # fc1 bias
            pl.BlockSpec((256, 128), lambda b: (0, 0)),           # fc2 (padded)
            pl.BlockSpec((1, 128), lambda b: (0, 0)),             # fc2 bias
        ],
        out_specs=(pl.BlockSpec((None, 8, 128), lambda b: (b, 0, 0)),
                   pl.BlockSpec((None, 1, 128), lambda b: (b, 0, 0))),
        scratch_shapes=[pltpu.VMEM((24, 256), jnp.float32)],
        compiler_params=pltpu.CompilerParams(
            dimension_semantics=("parallel",),
            vmem_limit_bytes=32 * 1024 * 1024),
    )(xr, prep["wb1"], prep["b1r"], prep["sel1"], prep["wb2"], prep["b2r"],
      prep["sel2"], prep["w1s"], prep["fb1"], prep["w2p"], prep["fb2"])

    logits = logits_pad[:, 0, :num_classes]
    # torch.flatten(features(x), 1): NCHW channel-major ordering.
    flat = jnp.transpose(feat.reshape(B, 8, 8, 16), (0, 3, 1, 2)).reshape(B, 1024)
    return logits, flat


# ----------------------------------------------------------------------------
# Deterministic synthetic parameters (PyTorch-style fan-in uniform init)
# ----------------------------------------------------------------------------
def init_params(key, num_classes=10):
    ks = jax.random.split(key, 8)

    def u(k, shape, fan_in):
        bound = 1.0 / float(fan_in) ** 0.5
        return jax.random.uniform(k, shape, jnp.float32, -bound, bound)

    return {
        "conv1_w": u(ks[0], (16, 3, 3, 3), 3 * 9),      # (Cout, Cin, kh, kw)
        "conv1_b": u(ks[1], (16,), 3 * 9),
        "conv2_w": u(ks[2], (16, 16, 3, 3), 16 * 9),
        "conv2_b": u(ks[3], (16,), 16 * 9),
        "fc1_w": u(ks[4], (1024, 256), 1024),           # stored as (in, out)
        "fc1_b": u(ks[5], (256,), 1024),
        "fc2_w": u(ks[6], (256, num_classes), 256),     # stored as (in, out)
        "fc2_b": u(ks[7], (num_classes,), 256),
    }


# ----------------------------------------------------------------------------
# Pure-JAX reference for a correctness check
# ----------------------------------------------------------------------------
def reference_forward(x_nchw, params):
    x = jnp.transpose(x_nchw, (0, 2, 3, 1))

    def conv(x, w, b):
        wf = jnp.transpose(w, (2, 3, 1, 0))  # HWIO
        y = jax.lax.conv_general_dilated(
            x, wf, (1, 1), "SAME",
            dimension_numbers=("NHWC", "HWIO", "NHWC"),
            precision=jax.lax.Precision.HIGHEST)
        return jnp.maximum(y + b, 0.0)

    def pool(x):
        return jax.lax.reduce_window(x, -jnp.inf, jax.lax.max,
                                     (1, 2, 2, 1), (1, 2, 2, 1), "VALID")

    x = pool(conv(x, params["conv1_w"], params["conv1_b"]))
    x = pool(conv(x, params["conv2_w"], params["conv2_b"]))
    B = x.shape[0]
    flat = jnp.transpose(x, (0, 3, 1, 2)).reshape(B, -1)
    h = jnp.maximum(
        jnp.dot(flat, params["fc1_w"], precision=jax.lax.Precision.HIGHEST)
        + params["fc1_b"], 0.0)
    logits = jnp.dot(h, params["fc2_w"],
                     precision=jax.lax.Precision.HIGHEST) + params["fc2_b"]
    return logits, flat


if __name__ == "__main__":
    key = jax.random.PRNGKey(0)
    pkey, xkey = jax.random.split(key)
    params = init_params(pkey, num_classes=10)
    prep = prepare_params(params, num_classes=10)

    # Input consistent with the module: Linear(1024, ...) implies 3x32x32 input.
    x = jax.random.normal(xkey, (2, 3, 32, 32), jnp.float32)

    fwd = jax.jit(functools.partial(forward, num_classes=10))
    logits, flat = fwd(x, prep)
    jax.block_until_ready((logits, flat))

    assert logits.shape == (2, 10) and logits.dtype == jnp.float32
    assert flat.shape == (2, 1024) and flat.dtype == jnp.float32

    ref_logits, ref_flat = reference_forward(x, params)
    assert jnp.allclose(flat, ref_flat, atol=2e-2, rtol=2e-2), \
        float(jnp.max(jnp.abs(flat - ref_flat)))
    assert jnp.allclose(logits, ref_logits, atol=2e-2, rtol=2e-2), \
        float(jnp.max(jnp.abs(logits - ref_logits)))

    print("KERNEL_OK")
</pallas_src>

<mosaic_0001>
module attributes {stable_mosaic.version = 11 : i64} {
  func.func @_fused_forward_kernel(%arg0: i32, %arg1: memref<1x34x128xf32, #tpu.memory_space<vmem>>, %arg2: memref<3x128x512xbf16, #tpu.memory_space<vmem>>, %arg3: memref<1x512xf32, #tpu.memory_space<vmem>>, %arg4: memref<2x16x32xf32, #tpu.memory_space<vmem>>, %arg5: memref<3x256x256xbf16, #tpu.memory_space<vmem>>, %arg6: memref<1x256xf32, #tpu.memory_space<vmem>>, %arg7: memref<2x8x16xf32, #tpu.memory_space<vmem>>, %arg8: memref<8x128x256xbf16, #tpu.memory_space<vmem>>, %arg9: memref<1x256xf32, #tpu.memory_space<vmem>>, %arg10: memref<256x128xbf16, #tpu.memory_space<vmem>>, %arg11: memref<1x128xf32, #tpu.memory_space<vmem>>, %arg12: memref<1x8x128xf32, #tpu.memory_space<vmem>>, %arg13: memref<1x1x128xf32, #tpu.memory_space<vmem>>, %arg14: memref<24x256xf32, #tpu.memory_space<vmem>>) attributes {dimension_semantics = [#tpu.dimension_semantics<parallel>], iteration_bounds = array<i64: 2>, scalar_prefetch = 0 : i64, scratch_operands = 1 : i64, tpu.core_type = #tpu.core_type<tc>, window_params = [{transform_indices = @transform_0, window_bounds = array<i64: 1, 34, 128>}, {pipeline_mode = #tpu.pipeline_mode<synchronous>, transform_indices = @transform_1, window_bounds = array<i64: 3, 128, 512>}, {pipeline_mode = #tpu.pipeline_mode<synchronous>, transform_indices = @transform_2, window_bounds = array<i64: 1, 512>}, {pipeline_mode = #tpu.pipeline_mode<synchronous>, transform_indices = @transform_3, window_bounds = array<i64: 2, 16, 32>}, {pipeline_mode = #tpu.pipeline_mode<synchronous>, transform_indices = @transform_4, window_bounds = array<i64: 3, 256, 256>}, {pipeline_mode = #tpu.pipeline_mode<synchronous>, transform_indices = @transform_5, window_bounds = array<i64: 1, 256>}, {pipeline_mode = #tpu.pipeline_mode<synchronous>, transform_indices = @transform_6, window_bounds = array<i64: 2, 8, 16>}, {pipeline_mode = #tpu.pipeline_mode<synchronous>, transform_indices = @transform_7, window_bounds = array<i64: 8, 128, 256>}, {pipeline_mode = #tpu.pipeline_mode<synchronous>, transform_indices = @transform_8, window_bounds = array<i64: 1, 256>}, {pipeline_mode = #tpu.pipeline_mode<synchronous>, transform_indices = @transform_9, window_bounds = array<i64: 256, 128>}, {pipeline_mode = #tpu.pipeline_mode<synchronous>, transform_indices = @transform_10, window_bounds = array<i64: 1, 128>}, {transform_indices = @transform_11, window_bounds = array<i64: 1, 8, 128>}, {transform_indices = @transform_12, window_bounds = array<i64: 1, 1, 128>}]} {
    %cst = arith.constant 0.000000e+00 : f32
    %0 = vector.broadcast %cst : f32 to vector<32x512xf32>
    %c0 = arith.constant 0 : index
    %c0_0 = arith.constant 0 : index
    %c0_1 = arith.constant 0 : index
    %1 = vector.load %arg1[%c0, %c0_0, %c0_1] : memref<1x34x128xf32, #tpu.memory_space<vmem>>, vector<1x32x128xf32>
    %2 = vector.shape_cast %1 : vector<1x32x128xf32> to vector<32x128xf32>
    %3 = arith.truncf %2 : vector<32x128xf32> to vector<32x128xbf16>
    %c0_2 = arith.constant 0 : index
    %c0_3 = arith.constant 0 : index
    %c0_4 = arith.constant 0 : index
    %4 = vector.load %arg2[%c0_2, %c0_3, %c0_4] : memref<3x128x512xbf16, #tpu.memory_space<vmem>>, vector<1x128x512xbf16>
    %5 = vector.shape_cast %4 : vector<1x128x512xbf16> to vector<128x512xbf16>
    %cst_5 = arith.constant dense<0.000000e+00> : vector<32x512xf32>
    %6 = tpu.matmul %3, %5, %cst_5 {dimension_numbers = #tpu.dot_dimension_numbers<[1], [0], [0], [1], [0, 0, 1, 1], [], []>} : vector<32x128xbf16>, vector<128x512xbf16>, vector<32x512xf32> -> vector<32x512xf32>
    %7 = arith.addf %0, %6 : vector<32x512xf32>
    %c0_6 = arith.constant 0 : index
    %c1 = arith.constant 1 : index
    %c0_7 = arith.constant 0 : index
    %8 = vector.load %arg1[%c0_6, %c1, %c0_7] : memref<1x34x128xf32, #tpu.memory_space<vmem>>, vector<1x32x128xf32>
    %9 = vector.shape_cast %8 : vector<1x32x128xf32> to vector<32x128xf32>
    %10 = arith.truncf %9 : vector<32x128xf32> to vector<32x128xbf16>
    %c1_8 = arith.constant 1 : index
    %c0_9 = arith.constant 0 : index
    %c0_10 = arith.constant 0 : index
    %11 = vector.load %arg2[%c1_8, %c0_9, %c0_10] : memref<3x128x512xbf16, #tpu.memory_space<vmem>>, vector<1x128x512xbf16>
    %12 = vector.shape_cast %11 : vector<1x128x512xbf16> to vector<128x512xbf16>
    %cst_11 = arith.constant dense<0.000000e+00> : vector<32x512xf32>
    %13 = tpu.matmul %10, %12, %cst_11 {dimension_numbers = #tpu.dot_dimension_numbers<[1], [0], [0], [1], [0, 0, 1, 1], [], []>} : vector<32x128xbf16>, vector<128x512xbf16>, vector<32x512xf32> -> vector<32x512xf32>
    %14 = arith.addf %7, %13 : vector<32x512xf32>
    %c0_12 = arith.constant 0 : index
    %c2 = arith.constant 2 : index
    %c0_13 = arith.constant 0 : index
    %15 = vector.load %arg1[%c0_12, %c2, %c0_13] : memref<1x34x128xf32, #tpu.memory_space<vmem>>, vector<1x32x128xf32>
    %16 = vector.shape_cast %15 : vector<1x32x128xf32> to vector<32x128xf32>
    %17 = arith.truncf %16 : vector<32x128xf32> to vector<32x128xbf16>
    %c2_14 = arith.constant 2 : index
    %c0_15 = arith.constant 0 : index
    %c0_16 = arith.constant 0 : index
    %18 = vector.load %arg2[%c2_14, %c0_15, %c0_16] : memref<3x128x512xbf16, #tpu.memory_space<vmem>>, vector<1x128x512xbf16>
    %19 = vector.shape_cast %18 : vector<1x128x512xbf16> to vector<128x512xbf16>
    %cst_17 = arith.constant dense<0.000000e+00> : vector<32x512xf32>
    %20 = tpu.matmul %17, %19, %cst_17 {dimension_numbers = #tpu.dot_dimension_numbers<[1], [0], [0], [1], [0, 0, 1, 1], [], []>} : vector<32x128xbf16>, vector<128x512xbf16>, vector<32x512xf32> -> vector<32x512xf32>
    %21 = arith.addf %14, %20 : vector<32x512xf32>
    %c0_18 = arith.constant 0 : index
    %c0_19 = arith.constant 0 : index
    %22 = vector.load %arg3[%c0_18, %c0_19] : memref<1x512xf32, #tpu.memory_space<vmem>>, vector<1x512xf32>
    %23 = vector.broadcast %22 : vector<1x512xf32> to vector<32x512xf32>
    %24 = arith.addf %21, %23 : vector<32x512xf32>
    %cst_20 = arith.constant 0.000000e+00 : f32
    %25 = vector.broadcast %cst_20 : f32 to vector<32x512xf32>
    %26 = arith.maximumf %24, %25 : vector<32x512xf32>
    %27 = vector.extract_strided_slice %26 {offsets = [0, 0], sizes = [32, 256], strides = [1, 1]} : vector<32x512xf32> to vector<32x256xf32>
    %28 = vector.extract_strided_slice %26 {offsets = [0, 256], sizes = [32, 256], strides = [1, 1]} : vector<32x512xf32> to vector<32x256xf32>
    %29 = arith.maximumf %27, %28 : vector<32x256xf32>
    %c0_21 = arith.constant 0 : index
    %c0_22 = arith.constant 0 : index
    %c0_23 = arith.constant 0 : index
    %30 = vector.load %arg4[%c0_21, %c0_22, %c0_23] : memref<2x16x32xf32, #tpu.memory_space<vmem>>, vector<1x16x32xf32>
    %31 = vector.shape_cast %30 : vector<1x16x32xf32> to vector<16x32xf32>
    %cst_24 = arith.constant dense<0.000000e+00> : vector<16x256xf32>
    %32 = tpu.matmul %31, %29, %cst_24 {dimension_numbers = #tpu.dot_dimension_numbers<[1], [0], [0], [1], [0, 0, 1, 1], [], []>} : vector<16x32xf32>, vector<32x256xf32>, vector<16x256xf32> -> vector<16x256xf32>
    %c1_25 = arith.constant 1 : index
    %c0_26 = arith.constant 0 : index
    %c0_27 = arith.constant 0 : index
    %33 = vector.load %arg4[%c1_25, %c0_26, %c0_27] : memref<2x16x32xf32, #tpu.memory_space<vmem>>, vector<1x16x32xf32>
    %34 = vector.shape_cast %33 : vector<1x16x32xf32> to vector<16x32xf32>
    %cst_28 = arith.constant dense<0.000000e+00> : vector<16x256xf32>
    %35 = tpu.matmul %34, %29, %cst_28 {dimension_numbers = #tpu.dot_dimension_numbers<[1], [0], [0], [1], [0, 0, 1, 1], [], []>} : vector<16x32xf32>, vector<32x256xf32>, vector<16x256xf32> -> vector<16x256xf32>
    %36 = arith.maximumf %32, %35 : vector<16x256xf32>
    %cst_29 = arith.constant 0.000000e+00 : f32
    %37 = vector.broadcast %cst_29 : f32 to vector<1x256xf32>
    %c0_30 = arith.constant 0 : index
    %c0_31 = arith.constant 0 : index
    %38 = vector.load %arg14[%c0_30, %c0_31] : memref<24x256xf32, #tpu.memory_space<vmem>>, vector<1x256xf32>
    tpu.vector_store %arg14[%c0_30, %c0_31], %37 {strides = array<i32>} : memref<24x256xf32, #tpu.memory_space<vmem>>, vector<1x256xf32>,
    %c17 = arith.constant 17 : index
    %c0_32 = arith.constant 0 : index
    %39 = vector.load %arg14[%c17, %c0_32] : memref<24x256xf32, #tpu.memory_space<vmem>>, vector<1x256xf32>
    tpu.vector_store %arg14[%c17, %c0_32], %37 {strides = array<i32>} : memref<24x256xf32, #tpu.memory_space<vmem>>, vector<1x256xf32>,
    %c1_33 = arith.constant 1 : index
    %c0_34 = arith.constant 0 : index
    %40 = vector.load %arg14[%c1_33, %c0_34] : memref<24x256xf32, #tpu.memory_space<vmem>>, vector<16x256xf32>
    tpu.vector_store %arg14[%c1_33, %c0_34], %36 {strides = array<i32>} : memref<24x256xf32, #tpu.memory_space<vmem>>, vector<16x256xf32>,
    %cst_35 = arith.constant 0.000000e+00 : f32
    %41 = vector.broadcast %cst_35 : f32 to vector<16x256xf32>
    %c0_36 = arith.constant 0 : index
    %c0_37 = arith.constant 0 : index
    %42 = vector.load %arg14[%c0_36, %c0_37] : memref<24x256xf32, #tpu.memory_space<vmem>>, vector<16x256xf32>
    %43 = arith.truncf %42 : vector<16x256xf32> to vector<16x256xbf16>
    %c0_38 = arith.constant 0 : index
    %c0_39 = arith.constant 0 : index
    %c0_40 = arith.constant 0 : index
    %44 = vector.load %arg5[%c0_38, %c0_39, %c0_40] : memref<3x256x256xbf16, #tpu.memory_space<vmem>>, vector<1x256x256xbf16>
    %45 = vector.shape_cast %44 : vector<1x256x256xbf16> to vector<256x256xbf16>
    %cst_41 = arith.constant dense<0.000000e+00> : vector<16x256xf32>
    %46 = tpu.matmul %43, %45, %cst_41 {dimension_numbers = #tpu.dot_dimension_numbers<[1], [0], [0], [1], [0, 0, 1, 1], [], []>} : vector<16x256xbf16>, vector<256x256xbf16>, vector<16x256xf32> -> vector<16x256xf32>
    %47 = arith.addf %41, %46 : vector<16x256xf32>
    %c1_42 = arith.constant 1 : index
    %c0_43 = arith.constant 0 : index
    %48 = vector.load %arg14[%c1_42, %c0_43] : memref<24x256xf32, #tpu.memory_space<vmem>>, vector<16x256xf32>
    %49 = arith.truncf %48 : vector<16x256xf32> to vector<16x256xbf16>
    %c1_44 = arith.constant 1 : index
    %c0_45 = arith.constant 0 : index
    %c0_46 = arith.constant 0 : index
    %50 = vector.load %arg5[%c1_44, %c0_45, %c0_46] : memref<3x256x256xbf16, #tpu.memory_space<vmem>>, vector<1x256x256xbf16>
    %51 = vector.shape_cast %50 : vector<1x256x256xbf16> to vector<256x256xbf16>
    %cst_47 = arith.constant dense<0.000000e+00> : vector<16x256xf32>
    %52 = tpu.matmul %49, %51, %cst_47 {dimension_numbers = #tpu.dot_dimension_numbers<[1], [0], [0], [1], [0, 0, 1, 1], [], []>} : vector<16x256xbf16>, vector<256x256xbf16>, vector<16x256xf32> -> vector<16x256xf32>
    %53 = arith.addf %47, %52 : vector<16x256xf32>
    %c2_48 = arith.constant 2 : index
    %c0_49 = arith.constant 0 : index
    %54 = vector.load %arg14[%c2_48, %c0_49] : memref<24x256xf32, #tpu.memory_space<vmem>>, vector<16x256xf32>
    %55 = arith.truncf %54 : vector<16x256xf32> to vector<16x256xbf16>
    %c2_50 = arith.constant 2 : index
    %c0_51 = arith.constant 0 : index
    %c0_52 = arith.constant 0 : index
    %56 = vector.load %arg5[%c2_50, %c0_51, %c0_52] : memref<3x256x256xbf16, #tpu.memory_space<vmem>>, vector<1x256x256xbf16>
    %57 = vector.shape_cast %56 : vector<1x256x256xbf16> to vector<256x256xbf16>
    %cst_53 = arith.constant dense<0.000000e+00> : vector<16x256xf32>
    %58 = tpu.matmul %55, %57, %cst_53 {dimension_numbers = #tpu.dot_dimension_numbers<[1], [0], [0], [1], [0, 0, 1, 1], [], []>} : vector<16x256xbf16>, vector<256x256xbf16>, vector<16x256xf32> -> vector<16x256xf32>
    %59 = arith.addf %53, %58 : vector<16x256xf32>
    %c0_54 = arith.constant 0 : index
    %c0_55 = arith.constant 0 : index
    %60 = vector.load %arg6[%c0_54, %c0_55] : memref<1x256xf32, #tpu.memory_space<vmem>>, vector<1x256xf32>
    %61 = vector.broadcast %60 : vector<1x256xf32> to vector<16x256xf32>
    %62 = arith.addf %59, %61 : vector<16x256xf32>
    %cst_56 = arith.constant 0.000000e+00 : f32
    %63 = vector.broadcast %cst_56 : f32 to vector<16x256xf32>
    %64 = arith.maximumf %62, %63 : vector<16x256xf32>
    %65 = vector.extract_strided_slice %64 {offsets = [0, 0], sizes = [16, 128], strides = [1, 1]} : vector<16x256xf32> to vector<16x128xf32>
    %66 = vector.extract_strided_slice %64 {offsets = [0, 128], sizes = [16, 128], strides = [1, 1]} : vector<16x256xf32> to vector<16x128xf32>
    %67 = arith.maximumf %65, %66 : vector<16x128xf32>
    %c0_57 = arith.constant 0 : index
    %c0_58 = arith.constant 0 : index
    %c0_59 = arith.constant 0 : index
    %68 = vector.load %arg7[%c0_57, %c0_58, %c0_59] : memref<2x8x16xf32, #tpu.memory_space<vmem>>, vector<1x8x16xf32>
    %69 = vector.shape_cast %68 : vector<1x8x16xf32> to vector<8x16xf32>
    %cst_60 = arith.constant dense<0.000000e+00> : vector<8x128xf32>
    %70 = tpu.matmul %69, %67, %cst_60 {dimension_numbers = #tpu.dot_dimension_numbers<[1], [0], [0], [1], [0, 0, 1, 1], [], []>} : vector<8x16xf32>, vector<16x128xf32>, vector<8x128xf32> -> vector<8x128xf32>
    %c1_61 = arith.constant 1 : index
    %c0_62 = arith.constant 0 : index
    %c0_63 = arith.constant 0 : index
    %71 = vector.load %arg7[%c1_61, %c0_62, %c0_63] : memref<2x8x16xf32, #tpu.memory_space<vmem>>, vector<1x8x16xf32>
    %72 = vector.shape_cast %71 : vector<1x8x16xf32> to vector<8x16xf32>
    %cst_64 = arith.constant dense<0.000000e+00> : vector<8x128xf32>
    %73 = tpu.matmul %72, %67, %cst_64 {dimension_numbers = #tpu.dot_dimension_numbers<[1], [0], [0], [1], [0, 0, 1, 1], [], []>} : vector<8x16xf32>, vector<16x128xf32>, vector<8x128xf32> -> vector<8x128xf32>
    %74 = arith.maximumf %70, %73 : vector<8x128xf32>
    %c0_65 = arith.constant 0 : index
    %c0_66 = arith.constant 0 : index
    %c0_67 = arith.constant 0 : index
    %75 = vector.load %arg12[%c0_65, %c0_66, %c0_67] : memref<1x8x128xf32, #tpu.memory_space<vmem>>, vector<1x8x128xf32>
    %76 = vector.shape_cast %75 : vector<1x8x128xf32> to vector<8x128xf32>
    %77 = vector.shape_cast %74 : vector<8x128xf32> to vector<1x8x128xf32>
    tpu.vector_store %arg12[%c0_65, %c0_66, %c0_67], %77 {strides = array<i32>} : memref<1x8x128xf32, #tpu.memory_space<vmem>>, vector<1x8x128xf32>,
    %c0_68 = arith.constant 0 : index
    %c0_69 = arith.constant 0 : index
    %78 = vector.load %arg9[%c0_68, %c0_69] : memref<1x256xf32, #tpu.memory_space<vmem>>, vector<1x256xf32>
    %79 = vector.extract_strided_slice %74 {offsets = [0, 0], sizes = [1, 128], strides = [1, 1]} : vector<8x128xf32> to vector<1x128xf32>
    %80 = arith.truncf %79 : vector<1x128xf32> to vector<1x128xbf16>
    %c0_70 = arith.constant 0 : index
    %c0_71 = arith.constant 0 : index
    %c0_72 = arith.constant 0 : index
    %81 = vector.load %arg8[%c0_70, %c0_71, %c0_72] : memref<8x128x256xbf16, #tpu.memory_space<vmem>>, vector<1x128x256xbf16>
    %82 = vector.shape_cast %81 : vector<1x128x256xbf16> to vector<128x256xbf16>
    %cst_73 = arith.constant dense<0.000000e+00> : vector<1x256xf32>
    %83 = tpu.matmul %80, %82, %cst_73 {dimension_numbers = #tpu.dot_dimension_numbers<[1], [0], [0], [1], [0, 0, 1, 1], [], []>} : vector<1x128xbf16>, vector<128x256xbf16>, vector<1x256xf32> -> vector<1x256xf32>
    %84 = arith.addf %78, %83 : vector<1x256xf32>
    %85 = vector.extract_strided_slice %74 {offsets = [1, 0], sizes = [1, 128], strides = [1, 1]} : vector<8x128xf32> to vector<1x128xf32>
    %86 = arith.truncf %85 : vector<1x128xf32> to vector<1x128xbf16>
    %c1_74 = arith.constant 1 : index
    %c0_75 = arith.constant 0 : index
    %c0_76 = arith.constant 0 : index
    %87 = vector.load %arg8[%c1_74, %c0_75, %c0_76] : memref<8x128x256xbf16, #tpu.memory_space<vmem>>, vector<1x128x256xbf16>
    %88 = vector.shape_cast %87 : vector<1x128x256xbf16> to vector<128x256xbf16>
    %cst_77 = arith.constant dense<0.000000e+00> : vector<1x256xf32>
    %89 = tpu.matmul %86, %88, %cst_77 {dimension_numbers = #tpu.dot_dimension_numbers<[1], [0], [0], [1], [0, 0, 1, 1], [], []>} : vector<1x128xbf16>, vector<128x256xbf16>, vector<1x256xf32> -> vector<1x256xf32>
    %90 = arith.addf %84, %89 : vector<1x256xf32>
    %91 = vector.extract_strided_slice %74 {offsets = [2, 0], sizes = [1, 128], strides = [1, 1]} : vector<8x128xf32> to vector<1x128xf32>
    %92 = arith.truncf %91 : vector<1x128xf32> to vector<1x128xbf16>
    %c2_78 = arith.constant 2 : index
    %c0_79 = arith.constant 0 : index
    %c0_80 = arith.constant 0 : index
    %93 = vector.load %arg8[%c2_78, %c0_79, %c0_80] : memref<8x128x256xbf16, #tpu.memory_space<vmem>>, vector<1x128x256xbf16>
    %94 = vector.shape_cast %93 : vector<1x128x256xbf16> to vector<128x256xbf16>
    %cst_81 = arith.constant dense<0.000000e+00> : vector<1x256xf32>
    %95 = tpu.matmul %92, %94, %cst_81 {dimension_numbers = #tpu.dot_dimension_numbers<[1], [0], [0], [1], [0, 0, 1, 1], [], []>} : vector<1x128xbf16>, vector<128x256xbf16>, vector<1x256xf32> -> vector<1x256xf32>
    %96 = arith.addf %90, %95 : vector<1x256xf32>
    %97 = vector.extract_strided_slice %74 {offsets = [3, 0], sizes = [1, 128], strides = [1, 1]} : vector<8x128xf32> to vector<1x128xf32>
    %98 = arith.truncf %97 : vector<1x128xf32> to vector<1x128xbf16>
    %c3 = arith.constant 3 : index
    %c0_82 = arith.constant 0 : index
    %c0_83 = arith.constant 0 : index
    %99 = vector.load %arg8[%c3, %c0_82, %c0_83] : memref<8x128x256xbf16, #tpu.memory_space<vmem>>, vector<1x128x256xbf16>
    %100 = vector.shape_cast %99 : vector<1x128x256xbf16> to vector<128x256xbf16>
    %cst_84 = arith.constant dense<0.000000e+00> : vector<1x256xf32>
    %101 = tpu.matmul %98, %100, %cst_84 {dimension_numbers = #tpu.dot_dimension_numbers<[1], [0], [0], [1], [0, 0, 1, 1], [], []>} : vector<1x128xbf16>, vector<128x256xbf16>, vector<1x256xf32> -> vector<1x256xf32>
    %102 = arith.addf %96, %101 : vector<1x256xf32>
    %103 = vector.extract_strided_slice %74 {offsets = [4, 0], sizes = [1, 128], strides = [1, 1]} : vector<8x128xf32> to vector<1x128xf32>
    %104 = arith.truncf %103 : vector<1x128xf32> to vector<1x128xbf16>
    %c4 = arith.constant 4 : index
    %c0_85 = arith.constant 0 : index
    %c0_86 = arith.constant 0 : index
    %105 = vector.load %arg8[%c4, %c0_85, %c0_86] : memref<8x128x256xbf16, #tpu.memory_space<vmem>>, vector<1x128x256xbf16>
    %106 = vector.shape_cast %105 : vector<1x128x256xbf16> to vector<128x256xbf16>
    %cst_87 = arith.constant dense<0.000000e+00> : vector<1x256xf32>
    %107 = tpu.matmul %104, %106, %cst_87 {dimension_numbers = #tpu.dot_dimension_numbers<[1], [0], [0], [1], [0, 0, 1, 1], [], []>} : vector<1x128xbf16>, vector<128x256xbf16>, vector<1x256xf32> -> vector<1x256xf32>
    %108 = arith.addf %102, %107 : vector<1x256xf32>
    %109 = vector.extract_strided_slice %74 {offsets = [5, 0], sizes = [1, 128], strides = [1, 1]} : vector<8x128xf32> to vector<1x128xf32>
    %110 = arith.truncf %109 : vector<1x128xf32> to vector<1x128xbf16>
    %c5 = arith.constant 5 : index
    %c0_88 = arith.constant 0 : index
    %c0_89 = arith.constant 0 : index
    %111 = vector.load %arg8[%c5, %c0_88, %c0_89] : memref<8x128x256xbf16, #tpu.memory_space<vmem>>, vector<1x128x256xbf16>
    %112 = vector.shape_cast %111 : vector<1x128x256xbf16> to vector<128x256xbf16>
    %cst_90 = arith.constant dense<0.000000e+00> : vector<1x256xf32>
    %113 = tpu.matmul %110, %112, %cst_90 {dimension_numbers = #tpu.dot_dimension_numbers<[1], [0], [0], [1], [0, 0, 1, 1], [], []>} : vector<1x128xbf16>, vector<128x256xbf16>, vector<1x256xf32> -> vector<1x256xf32>
    %114 = arith.addf %108, %113 : vector<1x256xf32>
    %115 = vector.extract_strided_slice %74 {offsets = [6, 0], sizes = [1, 128], strides = [1, 1]} : vector<8x128xf32> to vector<1x128xf32>
    %116 = arith.truncf %115 : vector<1x128xf32> to vector<1x128xbf16>
    %c6 = arith.constant 6 : index
    %c0_91 = arith.constant 0 : index
    %c0_92 = arith.constant 0 : index
    %117 = vector.load %arg8[%c6, %c0_91, %c0_92] : memref<8x128x256xbf16, #tpu.memory_space<vmem>>, vector<1x128x256xbf16>
    %118 = vector.shape_cast %117 : vector<1x128x256xbf16> to vector<128x256xbf16>
    %cst_93 = arith.constant dense<0.000000e+00> : vector<1x256xf32>
    %119 = tpu.matmul %116, %118, %cst_93 {dimension_numbers = #tpu.dot_dimension_numbers<[1], [0], [0], [1], [0, 0, 1, 1], [], []>} : vector<1x128xbf16>, vector<128x256xbf16>, vector<1x256xf32> -> vector<1x256xf32>
    %120 = arith.addf %114, %119 : vector<1x256xf32>
    %121 = vector.extract_strided_slice %74 {offsets = [7, 0], sizes = [1, 128], strides = [1, 1]} : vector<8x128xf32> to vector<1x128xf32>
    %122 = arith.truncf %121 : vector<1x128xf32> to vector<1x128xbf16>
    %c7 = arith.constant 7 : index
    %c0_94 = arith.constant 0 : index
    %c0_95 = arith.constant 0 : index
    %123 = vector.load %arg8[%c7, %c0_94, %c0_95] : memref<8x128x256xbf16, #tpu.memory_space<vmem>>, vector<1x128x256xbf16>
    %124 = vector.shape_cast %123 : vector<1x128x256xbf16> to vector<128x256xbf16>
    %cst_96 = arith.constant dense<0.000000e+00> : vector<1x256xf32>
    %125 = tpu.matmul %122, %124, %cst_96 {dimension_numbers = #tpu.dot_dimension_numbers<[1], [0], [0], [1], [0, 0, 1, 1], [], []>} : vector<1x128xbf16>, vector<128x256xbf16>, vector<1x256xf32> -> vector<1x256xf32>
    %126 = arith.addf %120, %125 : vector<1x256xf32>
    %cst_97 = arith.constant 0.000000e+00 : f32
    %127 = vector.broadcast %cst_97 : f32 to vector<1x256xf32>
    %128 = arith.maximumf %126, %127 : vector<1x256xf32>
    %129 = arith.truncf %128 : vector<1x256xf32> to vector<1x256xbf16>
    %c0_98 = arith.constant 0 : index
    %c0_99 = arith.constant 0 : index
    %130 = vector.load %arg10[%c0_98, %c0_99] : memref<256x128xbf16, #tpu.memory_space<vmem>>, vector<256x128xbf16>
    %cst_100 = arith.constant dense<0.000000e+00> : vector<1x128xf32>
    %131 = tpu.matmul %129, %130, %cst_100 {dimension_numbers = #tpu.dot_dimension_numbers<[1], [0], [0], [1], [0, 0, 1, 1], [], []>} : vector<1x256xbf16>, vector<256x128xbf16>, vector<1x128xf32> -> vector<1x128xf32>
    %c0_101 = arith.constant 0 : index
    %c0_102 = arith.constant 0 : index
    %132 = vector.load %arg11[%c0_101, %c0_102] : memref<1x128xf32, #tpu.memory_space<vmem>>, vector<1x128xf32>
    %133 = arith.addf %131, %132 : vector<1x128xf32>
    %c0_103 = arith.constant 0 : index
    %c0_104 = arith.constant 0 : index
    %c0_105 = arith.constant 0 : index
    %134 = vector.load %arg13[%c0_103, %c0_104, %c0_105] : memref<1x1x128xf32, #tpu.memory_space<vmem>>, vector<1x1x128xf32>
    %135 = vector.shape_cast %134 : vector<1x1x128xf32> to vector<1x128xf32>
    %136 = vector.shape_cast %133 : vector<1x128xf32> to vector<1x1x128xf32>
    tpu.vector_store %arg13[%c0_103, %c0_104, %c0_105], %136 {strides = array<i32>} : memref<1x1x128xf32, #tpu.memory_space<vmem>>, vector<1x1x128xf32>,
    return
  }
  func.func @transform_0(%arg0: i32) -> (i32, i32, i32) {
    %c0_i32 = arith.constant 0 : i32
    %c0_i32_0 = arith.constant 0 : i32
    %c0_i32_1 = arith.constant 0 : i32
    return %arg0, %c0_i32, %c0_i32_0 : i32, i32, i32
  }
  func.func @transform_1(%arg0: i32) -> (i32, i32, i32) {
    %c0_i32 = arith.constant 0 : i32
    %c0_i32_0 = arith.constant 0 : i32
    %c0_i32_1 = arith.constant 0 : i32
    %c0_i32_2 = arith.constant 0 : i32
    return %c0_i32, %c0_i32_0, %c0_i32_1 : i32, i32, i32
  }
  func.func @transform_2(%arg0: i32) -> (i32, i32) {
    %c0_i32 = arith.constant 0 : i32
    %c0_i32_0 = arith.constant 0 : i32
    %c0_i32_1 = arith.constant 0 : i32
    return %c0_i32, %c0_i32_0 : i32, i32
  }
  func.func @transform_3(%arg0: i32) -> (i32, i32, i32) {
    %c0_i32 = arith.constant 0 : i32
    %c0_i32_0 = arith.constant 0 : i32
    %c0_i32_1 = arith.constant 0 : i32
    %c0_i32_2 = arith.constant 0 : i32
    return %c0_i32, %c0_i32_0, %c0_i32_1 : i32, i32, i32
  }
  func.func @transform_4(%arg0: i32) -> (i32, i32, i32) {
    %c0_i32 = arith.constant 0 : i32
    %c0_i32_0 = arith.constant 0 : i32
    %c0_i32_1 = arith.constant 0 : i32
    %c0_i32_2 = arith.constant 0 : i32
    return %c0_i32, %c0_i32_0, %c0_i32_1 : i32, i32, i32
  }
  func.func @transform_5(%arg0: i32) -> (i32, i32) {
    %c0_i32 = arith.constant 0 : i32
    %c0_i32_0 = arith.constant 0 : i32
    %c0_i32_1 = arith.constant 0 : i32
    return %c0_i32, %c0_i32_0 : i32, i32
  }
  func.func @transform_6(%arg0: i32) -> (i32, i32, i32) {
    %c0_i32 = arith.constant 0 : i32
    %c0_i32_0 = arith.constant 0 : i32
    %c0_i32_1 = arith.constant 0 : i32
    %c0_i32_2 = arith.constant 0 : i32
    return %c0_i32, %c0_i32_0, %c0_i32_1 : i32, i32, i32
  }
  func.func @transform_7(%arg0: i32) -> (i32, i32, i32) {
    %c0_i32 = arith.constant 0 : i32
    %c0_i32_0 = arith.constant 0 : i32
    %c0_i32_1 = arith.constant 0 : i32
    %c0_i32_2 = arith.constant 0 : i32
    return %c0_i32, %c0_i32_0, %c0_i32_1 : i32, i32, i32
  }
  func.func @transform_8(%arg0: i32) -> (i32, i32) {
    %c0_i32 = arith.constant 0 : i32
    %c0_i32_0 = arith.constant 0 : i32
    %c0_i32_1 = arith.constant 0 : i32
    return %c0_i32, %c0_i32_0 : i32, i32
  }
  func.func @transform_9(%arg0: i32) -> (i32, i32) {
    %c0_i32 = arith.constant 0 : i32
    %c0_i32_0 = arith.constant 0 : i32
    %c0_i32_1 = arith.constant 0 : i32
    return %c0_i32, %c0_i32_0 : i32, i32
  }
  func.func @transform_10(%arg0: i32) -> (i32, i32) {
    %c0_i32 = arith.constant 0 : i32
    %c0_i32_0 = arith.constant 0 : i32
    %c0_i32_1 = arith.constant 0 : i32
    return %c0_i32, %c0_i32_0 : i32, i32
  }
  func.func @transform_11(%arg0: i32) -> (i32, i32, i32) {
    %c0_i32 = arith.constant 0 : i32
    %c0_i32_0 = arith.constant 0 : i32
    %c0_i32_1 = arith.constant 0 : i32
    return %arg0, %c0_i32, %c0_i32_0 : i32, i32, i32
  }
  func.func @transform_12(%arg0: i32) -> (i32, i32, i32) {
    %c0_i32 = arith.constant 0 : i32
    %c0_i32_0 = arith.constant 0 : i32
    %c0_i32_1 = arith.constant 0 : i32
    return %arg0, %c0_i32, %c0_i32_0 : i32, i32, i32
  }
}

</mosaic_0001>

<bundles_post_ra>
// kernel: forward.1
= control target key start
LH: loop header
LB: loop body
LE: loop exit
PB: predicated region body
PF: predicated region fallthrough
CT: control target
= control target key end

     0   :  { %s6278_s0 = inlined_call_operand.vmem [shape: f32[2,34,128], index: 0, kind: input, shape index: {}]   ;;  %s6279_s1 = inlined_call_operand.vmem [shape: bf16[3,128,512], index: 1, kind: input, shape index: {}]   ;;  %s6280_s2 = inlined_call_operand.vmem [shape: f32[1,512], index: 2, kind: input, shape index: {}]   ;;  %s6281_s3 = inlined_call_operand.vmem [shape: f32[2,16,32], index: 3, kind: input, shape index: {}]   ;;  %s6282_s4 = inlined_call_operand.hbm [shape: bf16[3,256,256], index: 4, kind: input, shape index: {}]   ;;  %s6283_s5 = inlined_call_operand.hbm [shape: f32[1,256], index: 5, kind: input, shape index: {}]   ;;  %s6284_s6 = inlined_call_operand.hbm [shape: f32[2,8,16], index: 6, kind: input, shape index: {}]   ;;  %s6285_s7 = inlined_call_operand.hbm [shape: bf16[8,128,256], index: 7, kind: input, shape index: {}]   ;;  %s6286_s8 = inlined_call_operand.hbm [shape: f32[1,256], index: 8, kind: input, shape index: {}]   ;;  %s6287_s9 = inlined_call_operand.hbm [shape: bf16[256,128], index: 9, kind: input, shape index: {}]   ;;  %s6288_s10 = inlined_call_operand.vmem [shape: f32[1,128], index: 10, kind: input, shape index: {}]   ;;  %s6289_s11 = inlined_call_operand.vmem [shape: f32[2,8,128], index: 11, kind: output, shape index: {0}]   ;;  %s6290_s12 = inlined_call_operand.hbm [shape: f32[2,1,128], index: 12, kind: output, shape index: {1}]  }
   0x1   :  { %6307 = sst [smem:[#allocation27_spill]] %s6283_s5 }
   0x2   :  { %6308 = sst [smem:[#allocation28_spill]] %s6285_s7 }
   0x3   :  { %18 = vsyncpa [#allocation4], 0 }
   0x4   :  { %19 = vsyncpa [#allocation7], 0 }
   0x5   :  { %20 = vsyncpa [#allocation10], 0 }
   0x6   :  { %21 = vsyncpa [#allocation13], 0 }
   0x7   :  { %22 = vsyncpa [#allocation5], 0 }
   0x8   :  { %24 = vsyncpa [#allocation5 + $0x1], 0  ;;  %s5663_s21 = smov 0   ;;  %s5665_s22 = smov 0  }
   0x9   :  { %s5667_s23 = smov 0   ;;  %s5669_s24 = smov 0  }
   0xa LB: > { %6309 = sst [smem:[#allocation20_spill]] %s5577_s23  ;;  %s5684_s25 = sadd.s32 4294967295, %s5581_s24   ;;  %s5581_s24 = sphi %s5669_s24, %s6340_s24   ;;  %s5577_s23 = sphi %s5667_s23, %s6342_s23   ;;  %s5573_s22 = sphi %s5665_s22, %s6344_s22   ;;  %s5569_s21 = sphi %s5663_s21, %s6343_s21  }
   0xb   : > { %s4273_s26 = sadd.s32 4294967294, %s5581_s24   ;;  %s5688_s27 = sadd.s32 1, %s5581_s24  }
   0xc   : > { %6310 = sst [smem:[#allocation21_spill]] %s5688_s27  ;;  %s299_s28 = sadd.s32 1, %s5577_s23 }
   0xd   : > { %s296_s29 = ssub.s32 %s5581_s24, %s5688_s27  ;;  %p309_p0 = scmp.ne.s32.totalorder %s5577_s23, %s5573_s22 }
   0xe   : > { %p297_p1 = scmp.eq.s32.totalorder %s296_s29, 0  ;;  %p310_p2 = scmp.eq.s32.totalorder %s5684_s25, 1 }
   0xf   : > { %p315_p3 = scmp.ne.s32.totalorder %s5573_s22, %s5569_s21  ;;  %p316_p4 = scmp.eq.s32.totalorder %s4273_s26, 1 }
  0x10   : > { %s5699_s30 = scalar_select %p297_p1, %s5577_s23, %s299_s28  }
  0x11   : > { %p5701_p5 = por %p310_p2, %p309_p0  ;;  %p5705_p6 = por %p316_p4, %p315_p3 }
  0x12   : > { %6311 = sst [smem:[#allocation22_spill]] %s5699_s30  ;;  %p4274_p7 = scmp.ge.s32.totalorder %s5581_s24, 1 }
  0x13   : > { %s6312_s13 = scalar_select %p5701_p5, 1, 0 }
  0x14   : > { %s6313_s14 = scalar_select %p5705_p6, 1, 0 }
  0x15   : > { %p323_p8 = scmp.lt.s32.totalorder %s5581_s24, 3  ;;  %p6291_p9 = scmp.eq.s32.totalorder %s5684_s25, 0 }
  0x16   : > { %s5583_s16 = smov [#allocation6]   ;;  %s5584_s19 = smov [#allocation9]  }
  0x17   : > { %p5712_p10 = pnand %p4274_p7, %p323_p8  ;;  %s358_s17 = sshll.u32 %s5583_s16, 4  ;;  %s359_s17 = int_to_ptr.vmem [resolvable:$true] %s358_s17 }
  0x18   : > { %s381_s20 = sshll.u32 %s5584_s19, 4  ;;  %s5585_s26 = smov [#allocation3]   ;;  %s382_s20 = int_to_ptr.vmem [resolvable:$true] %s381_s20 }
  0x19   : > { %s6314_s15 = scalar_select %p5712_p10, 1, 0 }
  0x1a   : > { %p4771_p11 = pneg %p5712_p10  ;;  %s344_s28 = sshll.u32 %s5585_s26, 4  ;;  %s345_s28 = int_to_ptr.vmem [resolvable:$true] %s344_s28 }
  0x1b   : > { %s5360_s16 = scalar_lea.vmem %s359_s17, 32  ;;  %p5368_p3 = scmp.lt.s32.totalorder %s359_s17, %s359_s17 }
  0x1c   : > { %p5720_p12 = pnand %p6291_p9, %p4771_p11  ;;  %p5361_p0 = scmp.ne.s32.totalorder %s359_s17, %s5360_s16 }
  0x1d   : > { %p5369_p4 = scmp.lt.s32.totalorder %s5360_s16, %s5360_s16 }
  0x1e   : > { %p5726_p13 = pneg %p5720_p12 }
  0x1f   : > { %p5370_p7 = por %p5369_p4, %p5368_p3 }
  0x20   : > { %p5363_p1 = pnand %p5361_p0, %p5726_p13 }
  0x22   : > { %p5364_p2 = pneg %p5363_p1 }
  0x24   : > { %p5371_p8 = pnand %p5370_p7, %p5364_p2 }
  0x26   : > { %5374 = shalt.err (!%p5371_p8)
}
  0x27   : > { %s6317_s5 = sld [smem:[#allocation27_spill]]  ;;  %s5386_s30 = scalar_lea.vmem %s382_s20, 16384 }
  0x28   : > { %p5387_p11 = scmp.ne.s32.totalorder %s382_s20, %s5386_s30  ;;  %p5394_p5 = scmp.lt.s32.totalorder %s382_s20, %s382_s20 }
  0x29   : > { %p5395_p0 = scmp.lt.s32.totalorder %s5386_s30, %s5386_s30 }
  0x2a   : > { %p5389_p9 = pnand %p5387_p11, %p5726_p13 }
  0x2b   : > { %p5396_p1 = por %p5395_p0, %p5394_p5 }
  0x2c   : > { %p5390_p6 = pneg %p5389_p9 }
  0x2d   : > { %4777 = dma.hbm_to_vmem [thread:$0]  (!%p5720_p12), %s6317_s5, 32, %s359_s17, [#allocation7]  }
  0x2e   : > { %p5397_p10 = pnand %p5396_p1, %p5390_p6 }
  0x30   : > { %5400 = shalt.err (!%p5397_p10)
}
  0x31   : > { %s5586_s16 = smov 128   ;;  %s5587_s23 = smov 8  }
  0x32   : > { %s6318_s7 = sld [smem:[#allocation28_spill]]  ;;  %s5412_s26 = scalar_lea.vmem %s345_s28, 12288 }
  0x33   : > { %p5413_p9 = scmp.ne.s32.totalorder %s345_s28, %s5412_s26  ;;  %p5420_p6 = scmp.lt.s32.totalorder %s345_s28, %s345_s28 }
  0x34   : > { %p5421_p10 = scmp.lt.s32.totalorder %s5412_s26, %s5412_s26 }
  0x35   : > { %p5415_p2 = pnand %p5413_p9, %p5726_p13 }
  0x36   : > { %p5422_p3 = por %p5421_p10, %p5420_p6 }
  0x37   : > { %p5416_p5 = pneg %p5415_p2 }
  0x38   : > { %4783 = dma.hbm_to_vmem [thread:$0]  (!%p5720_p12), %s6318_s7, 16384, %s382_s20, [#allocation10], %s5586_s16, %s5586_s16, %s5587_s23  }
  0x39   : > { %p5423_p4 = pnand %p5422_p3, %p5416_p5 }
  0x3b   : > { %5426 = shalt.err (!%p5423_p4)
}
  0x3c   : > { %4774 = dma.hbm_to_vmem [thread:$0]  (!%p5720_p12), %s6282_s4, 12288, %s345_s28, [#allocation4], %s5586_s16, %s5586_s16, %s5587_s23  }
  0x3d   : > { %s5588_s20 = smov [#allocation8]   ;;  %s5589_s17 = smov [#allocation11]  }
  0x3e   : > { %s368_s19 = sshll.u32 %s5588_s20, 4  ;;  %s395_s7 = sshll.u32 %s5589_s17, 4  ;;  %s369_s19 = int_to_ptr.vmem [resolvable:$true] %s368_s19  ;;  %s396_s7 = int_to_ptr.vmem [resolvable:$true] %s395_s7 }
  0x3f   : > { %s5438_s27 = scalar_lea.vmem %s369_s19, 256  ;;  %p5446_p0 = scmp.lt.s32.totalorder %s369_s19, %s369_s19 }
  0x40   : > { %p5439_p7 = scmp.ne.s32.totalorder %s369_s19, %s5438_s27  ;;  %p5447_p1 = scmp.lt.s32.totalorder %s5438_s27, %s5438_s27 }
  0x42   : > { %p5441_p8 = pnand %p5439_p7, %p5726_p13  ;;  %p5448_p9 = por %p5447_p1, %p5446_p0 }
  0x44   : > { %p5442_p11 = pneg %p5441_p8 }
  0x46   : > { %p5449_p2 = pnand %p5448_p9, %p5442_p11 }
  0x48   : > { %5452 = shalt.err (!%p5449_p2)
}
  0x49   : > { %4780 = dma.hbm_to_vmem [thread:$0]  (!%p5720_p12), %s6284_s6, 256, %s369_s19, [#allocation7], %s5586_s16, %s5586_s16, %s5587_s23  }
  0x4a   : > { %s5464_s26 = scalar_lea.vmem %s396_s7, 32  ;;  %p5472_p3 = scmp.lt.s32.totalorder %s396_s7, %s396_s7 }
  0x4b   : > { %p5465_p5 = scmp.ne.s32.totalorder %s396_s7, %s5464_s26  ;;  %p5473_p4 = scmp.lt.s32.totalorder %s5464_s26, %s5464_s26 }
  0x4d   : > { %p5467_p6 = pnand %p5465_p5, %p5726_p13  ;;  %p5474_p7 = por %p5473_p4, %p5472_p3 }
  0x4f   : > { %p5468_p10 = pneg %p5467_p6 }
  0x51   : > { %p5475_p8 = pnand %p5474_p7, %p5468_p10 }
  0x53   : > { %5478 = shalt.err (!%p5475_p8)
}
  0x54   : > { %4786 = dma.hbm_to_vmem [thread:$0]  (!%p5720_p12), %s6286_s8, 32, %s396_s7, [#allocation10]  }
  0x55   : > { %s5590_s20 = smov [#allocation12]  }
  0x56   : > { %s405_s23 = sshll.u32 %s5590_s20, 4  ;;  %s406_s23 = int_to_ptr.vmem [resolvable:$true] %s405_s23 }
  0x57   : > { %s5490_s16 = scalar_lea.vmem %s406_s23, 2048  ;;  %p5498_p9 = scmp.lt.s32.totalorder %s406_s23, %s406_s23 }
  0x58   : > { %p5491_p11 = scmp.ne.s32.totalorder %s406_s23, %s5490_s16  ;;  %p5499_p2 = scmp.lt.s32.totalorder %s5490_s16, %s5490_s16 }
  0x5a   : > { %p5493_p0 = pnand %p5491_p11, %p5726_p13  ;;  %p5500_p5 = por %p5499_p2, %p5498_p9 }
  0x5c   : > { %p5494_p1 = pneg %p5493_p0 }
  0x5e   : > { %p5501_p6 = pnand %p5500_p5, %p5494_p1 }
  0x60   : > { %5504 = shalt.err (!%p5501_p6)
}
  0x61   : > { %s5591_s19 = smov 64   ;;  %s5592_s17 = smov 4  }
  0x62   : > { %4789 = dma.hbm_to_vmem [thread:$0]  (!%p5720_p12), %s6287_s9, 2048, %s406_s23, [#allocation13], %s5591_s19, %s5591_s19, %s5592_s17  }
  0x63   : > { %p6319_p10 = scmp.ne.s32.totalorder %s6314_s15, 0 }
  0x65   : > { %432 = sbr.rel (%p6319_p10) target bundleno = 1691 (0x69b), region = 64 }
  0x6a   : > { %p6320_p3 = scmp.eq.s32.totalorder %s5684_s25, 0 }
  0x6c   : > { %5548 = dma.done.wait (%p6320_p3), [#allocation4], 12288   ;;  %p6321_p13 = pmov %p6320_p3 }
  0x6d   : > { %p6322_p4 = pmov %p6320_p3 }
  0x6e   : > { %5550 = vsyncadd (%p6321_p13), [#allocation4], 4294955008 }
  0x6f   : > { %5552 = dma.done.wait (%p6322_p4), [#allocation7], 288   ;;  %p6323_p7 = pmov %p6320_p3 }
  0x70   : > { %p6324_p8 = pmov %p6320_p3 }
  0x71   : > { %5554 = vsyncadd (%p6323_p7), [#allocation7], 4294967008 }
  0x72   : > { %5556 = dma.done.wait (%p6324_p8), [#allocation10], 16416   ;;  %p6325_p12 = pmov %p6320_p3 }
  0x73   : > { %p6326_p11 = pmov %p6320_p3 }
  0x74   : > { %5558 = vsyncadd (%p6325_p12), [#allocation10], 4294950880 }
  0x75   : > { %5560 = dma.done.wait (%p6326_p11), [#allocation13], 2048   ;;  %p6327_p0 = pmov %p6320_p3 }
  0x76   : > { %v6297_v0 = vmov 0   ;;  %v4853_v1 = vld [vmem:[%s6279_s1 + $0x1e4] ss:$16 sps:$4 sm:$0xff]   ;;  %v4855_v2 = vld [vmem:[%s6279_s1 + $0x1ec] ss:$16 sps:$4 sm:$0xff]   ;;  %p497_p1 = scmp.lt.s32.totalorder %s5684_s25, 1 }
  0x77   : > { %5562 = vsyncadd (%p6327_p0), [#allocation13], 4294965248  ;;  %776 = vmatprep.mubr.bf16.mxu0 %v6297_v0  ;;  %829 = vmatprep.mubr.bf16.mxu1 %v6297_v0  ;;  %v4857_v3 = vld [vmem:[%s6279_s1 + $0x1e0] ss:$16 sps:$4 sm:$0xff]   ;;  %v4858_v4 = vld [vmem:[%s6279_s1 + $0x1e8] ss:$16 sps:$4 sm:$0xff]  }
  0x78   : > { %744 = vmatprep.subr.bf16.mxu0 %v4853_v1  ;;  %797 = vmatprep.subr.bf16.mxu1 %v4855_v2  ;;  %v4859_v5 = vld [vmem:[%s6279_s1 + $0x1c4] ss:$16 sps:$4 sm:$0xff]   ;;  %v4861_v6 = vld [vmem:[%s6279_s1 + $0x1cc] ss:$16 sps:$4 sm:$0xff]   ;;  %v4863_v7 = vld [vmem:[%s6279_s1 + $0x1c0] ss:$16 sps:$4 sm:$0xff]  }
  0x79   : > { %745 = vmatpush1.bf16.msra.mxu0 %v4857_v3  ;;  %798 = vmatpush1.bf16.msra.mxu1 %v4858_v4  ;;  %v4864_v8 = vld [vmem:[%s6279_s1 + $0x1c8] ss:$16 sps:$4 sm:$0xff]   ;;  %v4865_v9 = vld [vmem:[%s6279_s1 + $0x1a4] ss:$16 sps:$4 sm:$0xff]   ;;  %v4867_v10 = vld [vmem:[%s6279_s1 + $0x1ac] ss:$16 sps:$4 sm:$0xff]  }
  0x7a   : > { %746 = vmatprep.subr.bf16.mxu0 %v4859_v5  ;;  %799 = vmatprep.subr.bf16.mxu1 %v4861_v6  ;;  %v4869_v11 = vld [vmem:[%s6279_s1 + $0x1a0] ss:$16 sps:$4 sm:$0xff]   ;;  %v4870_v12 = vld [vmem:[%s6279_s1 + $0x1a8] ss:$16 sps:$4 sm:$0xff]   ;;  %v4871_v13 = vld [vmem:[%s6279_s1 + $0x184] ss:$16 sps:$4 sm:$0xff]  }
  0x7b   : > { %v4873_v14 = vld [vmem:[%s6279_s1 + $0x18c] ss:$16 sps:$4 sm:$0xff]   ;;  %v4875_v15 = vld [vmem:[%s6279_s1 + $0x180] ss:$16 sps:$4 sm:$0xff]   ;;  %v4876_v16 = vld [vmem:[%s6279_s1 + $0x188] ss:$16 sps:$4 sm:$0xff]  }
  0x7c   : > { %v4877_v17 = vld [vmem:[%s6279_s1 + $0x164] ss:$16 sps:$4 sm:$0xff]   ;;  %v4879_v18 = vld [vmem:[%s6279_s1 + $0x16c] ss:$16 sps:$4 sm:$0xff]   ;;  %v4881_v19 = vld [vmem:[%s6279_s1 + $0x160] ss:$16 sps:$4 sm:$0xff]  }
  0x7d   : > { %747 = vmatpush1.bf16.msra.mxu0 %v4863_v7  ;;  %800 = vmatpush1.bf16.msra.mxu1 %v4864_v8  ;;  %v4882_v20 = vld [vmem:[%s6279_s1 + $0x168] ss:$16 sps:$4 sm:$0xff]   ;;  %v4883_v21 = vld [vmem:[%s6279_s1 + $0x144] ss:$16 sps:$4 sm:$0xff]   ;;  %v4885_v22 = vld [vmem:[%s6279_s1 + $0x14c] ss:$16 sps:$4 sm:$0xff]  }
  0x7e   : > { %748 = vmatprep.subr.bf16.mxu0 %v4865_v9  ;;  %801 = vmatprep.subr.bf16.mxu1 %v4867_v10  ;;  %s5869_s18 = scalar_select %p497_p1, %s5684_s25, 1  ;;  %v4887_v23 = vld [vmem:[%s6279_s1 + $0x140] ss:$16 sps:$4 sm:$0xff]   ;;  %v4888_v24 = vld [vmem:[%s6279_s1 + $0x148] ss:$16 sps:$4 sm:$0xff]   ;;  %vm1501_vm1 = vcmask 261120  }
  0x7f   : > { %v4889_v25 = vld [vmem:[%s6279_s1 + $0x124] ss:$16 sps:$4 sm:$0xff]   ;;  %v4891_v26 = vld [vmem:[%s6279_s1 + $0x12c] ss:$16 sps:$4 sm:$0xff]   ;;  %v4893_v27 = vld [vmem:[%s6279_s1 + $0x120] ss:$16 sps:$4 sm:$0xff]  }
  0x80   : > { %s4744_s17 = smul.u32 40, %s5869_s18  ;;  %v4894_v28 = vld [vmem:[%s6279_s1 + $0x128] ss:$16 sps:$4 sm:$0xff]   ;;  %v4895_v29 = vld [vmem:[%s6279_s1 + $0x104] ss:$16 sps:$4 sm:$0xff]   ;;  %vm1688_vm2 = vcmask 1040384  }
  0x81   : > { %749 = vmatpush1.bf16.msra.mxu0 %v4869_v11  ;;  %802 = vmatpush1.bf16.msra.mxu1 %v4870_v12  ;;  %v4897_v30 = vld [vmem:[%s6279_s1 + $0x10c] ss:$16 sps:$4 sm:$0xff]   ;;  %v4899_v31 = vld [vmem:[%s6279_s1 + $0x100] ss:$16 sps:$4 sm:$0xff]   ;;  %v4900_v32 = vld [vmem:[%s6279_s1 + $0x108] ss:$16 sps:$4 sm:$0xff]  }
  0x82   : > { %750 = vmatprep.subr.bf16.mxu0 %v4871_v13  ;;  %803 = vmatprep.subr.bf16.mxu1 %v4873_v14  ;;  %s5899_s16 = scalar_lea.vmem %s6278_s0, %s4744_s17  ;;  %v4903_v35 = vld [vmem:[%s6279_s1 + $0xe4] ss:$16 sps:$4 sm:$0xff]   ;;  %v4906_v36 = vld [vmem:[%s6279_s1 + $0xec] ss:$16 sps:$4 sm:$0xff]   ;;  %v4901_v38 = vld [vmem:[%s6279_s1 + $0xe0] ss:$16 sps:$4 sm:$0xff]  }
  0x83   : > { %v545_v33 = vld [vmem:[%s5899_s16 + $0x1] sm:$0xff]  ;;  %v546_v34 = vld [vmem:[%s5899_s16 + $0x9] sm:$0xff]  ;;  %v547_v45 = vld [vmem:[%s5899_s16 + $0x11] sm:$0xff]  ;;  %vm1788_vm3 = vsmask.f32 7424  ;;  %vm2266_vm4 = vcmask 1046528  }
  0x84   : > { %v549_v37 = vpack.c.bf16 %v546_v34, %v545_v33  ;;  %v4904_v39 = vld [vmem:[%s6279_s1 + $0xe8] ss:$16 sps:$4 sm:$0xff]   ;;  %v4909_v40 = vld [vmem:[%s6279_s1 + $0xc4] ss:$16 sps:$4 sm:$0xff]   ;;  %v4912_v41 = vld [vmem:[%s6279_s1 + $0xcc] ss:$16 sps:$4 sm:$0xff]  }
  0x85   : > { %751 = vmatpush1.bf16.msra.mxu0 %v4875_v15  ;;  %804 = vmatpush1.bf16.msra.mxu1 %v4876_v16  ;;  %v4907_v42 = vld [vmem:[%s6279_s1 + $0xc0] ss:$16 sps:$4 sm:$0xff]   ;;  %v4910_v43 = vld [vmem:[%s6279_s1 + $0xc8] ss:$16 sps:$4 sm:$0xff]   ;;  %v4915_v44 = vld [vmem:[%s6279_s1 + $0xa4] ss:$16 sps:$4 sm:$0xff]  }
  0x86   : > { %752 = vmatprep.subr.bf16.mxu0 %v4877_v17  ;;  %805 = vmatprep.subr.bf16.mxu1 %v4879_v18  ;;  %v548_v46 = vld [vmem:[%s5899_s16 + $0x19] sm:$0xff]  ;;  %v4921_v51 = vld [vmem:[%s6279_s1 + $0x84] ss:$16 sps:$4 sm:$0xff]   ;;  %v508_v9 = vld [vmem:[%s5899_s16 + $0x8] sm:$0xff]  ;;  %vm5595_vm5 = vmmov 0   ;;  %vm2505_vm6 = vcmask 130048  }
  0x87   : > { %v4918_v47 = vld [vmem:[%s6279_s1 + $0xac] ss:$16 sps:$4 sm:$0xff]   ;;  %v4913_v48 = vld [vmem:[%s6279_s1 + $0xa0] ss:$16 sps:$4 sm:$0xff]   ;;  %v4916_v49 = vld [vmem:[%s6279_s1 + $0xa8] ss:$16 sps:$4 sm:$0xff]   ;;  %v550_v50 = vpack.c.bf16 %v548_v46, %v547_v45 }
  0x88   : > { %v4924_v52 = vld [vmem:[%s6279_s1 + $0x8c] ss:$16 sps:$4 sm:$0xff]   ;;  %v4919_v53 = vld [vmem:[%s6279_s1 + $0x80] ss:$16 sps:$4 sm:$0xff]   ;;  %v4922_v54 = vld [vmem:[%s6279_s1 + $0x88] ss:$16 sps:$4 sm:$0xff]  }
  0x89   : > { %753 = vmatpush1.bf16.msra.mxu0 %v4881_v19  ;;  %806 = vmatpush1.bf16.msra.mxu1 %v4882_v20  ;;  %v4927_v55 = vld [vmem:[%s6279_s1 + $0x64] ss:$16 sps:$4 sm:$0xff]   ;;  %v4930_v56 = vld [vmem:[%s6279_s1 + $0x6c] ss:$16 sps:$4 sm:$0xff]   ;;  %v4925_v57 = vld [vmem:[%s6279_s1 + $0x60] ss:$16 sps:$4 sm:$0xff]  }
  0x8a   : > { %754 = vmatprep.subr.bf16.mxu0 %v4883_v21  ;;  %807 = vmatprep.subr.bf16.mxu1 %v4885_v22  ;;  %v4928_v58 = vld [vmem:[%s6279_s1 + $0x68] ss:$16 sps:$4 sm:$0xff]   ;;  %v4933_v59 = vld [vmem:[%s6279_s1 + $0x44] ss:$16 sps:$4 sm:$0xff]   ;;  %v4936_v60 = vld [vmem:[%s6279_s1 + $0x4c] ss:$16 sps:$4 sm:$0xff]  }
  0x8b   : > { %v4931_v61 = vld [vmem:[%s6279_s1 + $0x40] ss:$16 sps:$4 sm:$0xff]   ;;  %v4934_v62 = vld [vmem:[%s6279_s1 + $0x48] ss:$16 sps:$4 sm:$0xff]   ;;  %v4939_v63 = vld [vmem:[%s6279_s1 + $0x24] ss:$16 sps:$4 sm:$0xff]  }
  0x8c   : > { %v4942_v1 = vld [vmem:[%s6279_s1 + $0x2c] ss:$16 sps:$4 sm:$0xff]   ;;  %v4937_v2 = vld [vmem:[%s6279_s1 + $0x20] ss:$16 sps:$4 sm:$0xff]   ;;  %v4940_v3 = vld [vmem:[%s6279_s1 + $0x28] ss:$16 sps:$4 sm:$0xff]  }
  0x8d   : > { %755 = vmatpush1.bf16.msra.mxu0 %v4887_v23  ;;  %808 = vmatpush1.bf16.msra.mxu1 %v4888_v24  ;;  %v4945_v4 = vld [vmem:[%s6279_s1 + $0x4] ss:$16 sps:$4 sm:$0xff]   ;;  %v4948_v5 = vld [vmem:[%s6279_s1 + $0xc] ss:$16 sps:$4 sm:$0xff]   ;;  %v4943_v6 = vld [vmem:[%s6279_s1] ss:$16 sps:$4 sm:$0xff]  }
  0x8e   : > { %756 = vmatprep.subr.bf16.mxu0 %v4889_v25  ;;  %809 = vmatprep.subr.bf16.mxu1 %v4891_v26  ;;  %v4946_v7 = vld [vmem:[%s6279_s1 + $0x8] ss:$16 sps:$4 sm:$0xff]   ;;  %v507_v8 = vld [vmem:[%s5899_s16] sm:$0xff]  ;;  %v4954_v11 = vld [vmem:[%s6279_s1 + $0x2ec] ss:$16 sps:$4 sm:$0xff]   ;;  %s4290_s30 = sshll.u32 %s5869_s18, 3 }
  0x8f   : > { %v4951_v10 = vld [vmem:[%s6279_s1 + $0x2e4] ss:$16 sps:$4 sm:$0xff]   ;;  %v511_v12 = vpack.c.bf16 %v508_v9, %v507_v8  ;;  %v4949_v13 = vld [vmem:[%s6279_s1 + $0x2e0] ss:$16 sps:$4 sm:$0xff]   ;;  %v4952_v14 = vld [vmem:[%s6279_s1 + $0x2e8] ss:$16 sps:$4 sm:$0xff]  }
  0x90   : > { %v4957_v15 = vld [vmem:[%s6279_s1 + $0x2c4] ss:$16 sps:$4 sm:$0xff]   ;;  %v4960_v16 = vld [vmem:[%s6279_s1 + $0x2cc] ss:$16 sps:$4 sm:$0xff]   ;;  %v4955_v17 = vld [vmem:[%s6279_s1 + $0x2c0] ss:$16 sps:$4 sm:$0xff]  }
  0x91   : > { %757 = vmatpush1.bf16.msra.mxu0 %v4893_v27  ;;  %810 = vmatpush1.bf16.msra.mxu1 %v4894_v28  ;;  %v4958_v18 = vld [vmem:[%s6279_s1 + $0x2c8] ss:$16 sps:$4 sm:$0xff]   ;;  %v509_v19 = vld [vmem:[%s5899_s16 + $0x10] sm:$0xff]  ;;  %v4966_v22 = vld [vmem:[%s6279_s1 + $0x2ac] ss:$16 sps:$4 sm:$0xff]   ;;  %s495_s18 = sand.u32 1, %s5573_s22  }
  0x92   : > { %758 = vmatprep.subr.bf16.mxu0 %v4895_v29  ;;  %811 = vmatprep.subr.bf16.mxu1 %v4897_v30  ;;  %v510_v20 = vld [vmem:[%s5899_s16 + $0x18] sm:$0xff]  ;;  %v4963_v21 = vld [vmem:[%s6279_s1 + $0x2a4] ss:$16 sps:$4 sm:$0xff]   ;;  %v4961_v23 = vld [vmem:[%s6279_s1 + $0x2a0] ss:$16 sps:$4 sm:$0xff]   ;;  %s4699_s28 = sshll.u32 %s5684_s25, 4 }
  0x93   : > { %v4964_v24 = vld [vmem:[%s6279_s1 + $0x2a8] ss:$16 sps:$4 sm:$0xff]   ;;  %v512_v25 = vpack.c.bf16 %v510_v20, %v509_v19  ;;  %v4969_v26 = vld [vmem:[%s6279_s1 + $0x284] ss:$16 sps:$4 sm:$0xff]   ;;  %v4972_v27 = vld [vmem:[%s6279_s1 + $0x28c] ss:$16 sps:$4 sm:$0xff]   ;;  %s6243_s26 = scalar_lea.hbm %s6290_s12, %s4699_s28 }
  0x94   : > { %v4967_v28 = vld [vmem:[%s6279_s1 + $0x280] ss:$16 sps:$4 sm:$0xff]   ;;  %v4970_v29 = vld [vmem:[%s6279_s1 + $0x288] ss:$16 sps:$4 sm:$0xff]   ;;  %v4975_v30 = vld [vmem:[%s6279_s1 + $0x264] ss:$16 sps:$4 sm:$0xff]  }
  0x95   : > { %759 = vmatpush1.bf16.msra.mxu0 %v4899_v31  ;;  %812 = vmatpush1.bf16.msra.mxu1 %v4900_v32  ;;  %v4978_v31 = vld [vmem:[%s6279_s1 + $0x26c] ss:$16 sps:$4 sm:$0xff]   ;;  %v4973_v32 = vld [vmem:[%s6279_s1 + $0x260] ss:$16 sps:$4 sm:$0xff]   ;;  %v4976_v33 = vld [vmem:[%s6279_s1 + $0x268] ss:$16 sps:$4 sm:$0xff]  }
  0x96   : > { %1010 = vmatprep.subr.bf16.mxu0 %v4903_v35  ;;  %1063 = vmatprep.subr.bf16.mxu1 %v4906_v36  ;;  %v4981_v34 = vld [vmem:[%s6279_s1 + $0x244] ss:$16 sps:$4 sm:$0xff]   ;;  %v4984_v35 = vld [vmem:[%s6279_s1 + $0x24c] ss:$16 sps:$4 sm:$0xff]   ;;  %v4979_v36 = vld [vmem:[%s6279_s1 + $0x240] ss:$16 sps:$4 sm:$0xff]  }
  0x97   : > { %v4994_v45 = vld [vmem:[%s6279_s1 + $0x208] ss:$16 sps:$4 sm:$0xff]   ;;  %s496_s7 = scalar_lea.vmem [#allocation14], %s495_s18  ;;  %s4119_s27 = scalar_lea.sflag [#allocation5], %s495_s18 }
  0x98   : > { %777 = vmatmul.mubr.bf16.vlgmr.msra.gmra.mxu0 %v549_v37  ;;  %830 = vmatmul.mubr.bf16.vlgmr.msra.gmra.mxu1 %v549_v37  ;;  %v4982_v37 = vld [vmem:[%s6279_s1 + $0x248] ss:$16 sps:$4 sm:$0xff]   ;;  %s4134_s15 = sshll.u32 %s496_s7, 4  ;;  %p6338_p2 = scmp.ne.s32.totalorder %s6312_s13, 0  ;;  %s4135_s15 = int_to_ptr.vmem [resolvable:$true] %s4134_s15 }
  0x99   : > { %1011 = vmatpush1.bf16.msra.mxu0 %v4901_v38  ;;  %1064 = vmatpush1.bf16.msra.mxu1 %v4904_v39  ;;  %v4987_v38 = vld [vmem:[%s6279_s1 + $0x224] ss:$16 sps:$4 sm:$0xff]   ;;  %v4990_v39 = vld [vmem:[%s6279_s1 + $0x22c] ss:$16 sps:$4 sm:$0xff]   ;;  %s5597_s25 = smov [#allocation14]  }
  0x9a   : > { %1012 = vmatprep.subr.bf16.mxu0 %v4909_v40  ;;  %1065 = vmatprep.subr.bf16.mxu1 %v4912_v41  ;;  %v4985_v40 = vld [vmem:[%s6279_s1 + $0x220] ss:$16 sps:$4 sm:$0xff]   ;;  %v4988_v41 = vld [vmem:[%s6279_s1 + $0x228] ss:$16 sps:$4 sm:$0xff]   ;;  %s5509_s20 = sshll.u32 %s5597_s25, 4  ;;  %s5510_s20 = int_to_ptr.vmem [resolvable:$false] %s5509_s20 }
  0x9b   : > { %786 = vmatprep.mubr.bf16.mxu0 %v6297_v0  ;;  %839 = vmatprep.mubr.bf16.mxu1 %v6297_v0  ;;  %v1116_v46 = vld [vmem:[%s5899_s16 + $0x2] sm:$0xff]  ;;  %s5511_s23 = scalar_lea.vmem %s5510_s20, 32  ;;  %p5512_p10 = scmp.lt.s32.totalorder %s4135_s15, %s5510_s20 }
  0x9d   : > { %1013 = vmatpush1.bf16.msra.mxu0 %v4907_v42  ;;  %1066 = vmatpush1.bf16.msra.mxu1 %v4910_v43  ;;  %v4993_v42 = vld [vmem:[%s6279_s1 + $0x204] ss:$16 sps:$4 sm:$0xff]   ;;  %v4996_v43 = vld [vmem:[%s6279_s1 + $0x20c] ss:$16 sps:$4 sm:$0xff]  }
  0x9e   : > { %1014 = vmatprep.subr.bf16.mxu0 %v4915_v44  ;;  %1067 = vmatprep.subr.bf16.mxu1 %v4918_v47  ;;  %v4991_v44 = vld [vmem:[%s6279_s1 + $0x200] ss:$16 sps:$4 sm:$0xff]  }
  0x9f   : > { %v1117_v47 = vld [vmem:[%s5899_s16 + $0xa] sm:$0xff] }
  0xa0   : > { %787 = vmatmul.mubr.bf16.gmra.mxu0 %v550_v50  ;;  %840 = vmatmul.mubr.bf16.gmra.mxu1 %v550_v50  ;;  %v1119_v50 = vld [vmem:[%s5899_s16 + $0x1a] sm:$0xff] }
  0xa1   : > { %1015 = vmatpush1.bf16.msra.mxu0 %v4913_v48  ;;  %1068 = vmatpush1.bf16.msra.mxu1 %v4916_v49  ;;  %v1120_v48 = vpack.c.bf16 %v1117_v47, %v1116_v46  ;;  %v1118_v49 = vld [vmem:[%s5899_s16 + $0x12] sm:$0xff]  ;;  %v1437_v46 = vld [vmem:[%s6280_s2] sm:$0xf]  ;;  %s505_s16 = scalar_lea.vmem %s6289_s11, %s4290_s30  ;;  %s5505_s30 = scalar_lea.vmem %s4135_s15, 16 }
  0xa2   : > { %1016 = vmatprep.subr.bf16.mxu0 %v4921_v51  ;;  %1069 = vmatprep.subr.bf16.mxu1 %v4924_v52  ;;  %v1121_v51 = vpack.c.bf16 %v1119_v50, %v1118_v49  ;;  %v1439_v52 = vlaneseq  ;;  %p5506_p9 = scmp.ne.s32.totalorder %s4135_s15, %s5505_s30  ;;  %p5513_p3 = scmp.lt.s32.totalorder %s5511_s23, %s5505_s30 }
  0xa3   : > { %1042 = vmatprep.mubr.bf16.mxu0 %v6297_v0  ;;  %1095 = vmatprep.mubr.bf16.mxu1 %v6297_v0 }
  0xa4   : > { %vm1677_vm0 = vcmp.lt.s32.totalorder %v1439_v52, 256  ;;  %p5507_p5 = pnand %p5506_p9, %p6338_p2  ;;  %p5514_p13 = por %p5513_p3, %p5512_p10 }
  0xa5   : > { %1017 = vmatpush1.bf16.msra.mxu0 %v4919_v53  ;;  %1070 = vmatpush1.bf16.msra.mxu1 %v4922_v54  ;;  %v6299_v53 = vmov 0.0   ;;  %v5003_v54 = vld [vmem:[#allocation3 + $0x170] ss:$8 sps:$4 sm:$0xff]  }
  0xa6   : > { %1018 = vmatprep.subr.bf16.mxu0 %v4927_v55  ;;  %1071 = vmatprep.subr.bf16.mxu1 %v4930_v56  ;;  %1679 = vst.msk [vmem:[#allocation2] ss:$8 sm:$0x3] %vm1677_vm0, %v6299_v53  ;;  %1682 = vst.msk [vmem:[#allocation2 + $0x21] ss:$8 sm:$0x3] %vm1677_vm0, %v6299_v53  ;;  %p5508_p6 = pneg %p5507_p5 }
  0xa7   : > { %v5005_v55 = vld [vmem:[#allocation3 + $0x174] ss:$8 sps:$4 sm:$0xff]   ;;  %v5009_v56 = vld [vmem:[#allocation3 + $0x160] ss:$8 sps:$4 sm:$0xff]  }
  0xa8   : > { %p5515_p4 = pnand %p5514_p13, %p5508_p6 }
  0xa9   : > { %1019 = vmatpush1.bf16.msra.mxu0 %v4925_v57  ;;  %1072 = vmatpush1.bf16.msra.mxu1 %v4928_v58  ;;  %v5011_v57 = vld [vmem:[#allocation3 + $0x164] ss:$8 sps:$4 sm:$0xff]   ;;  %v5015_v58 = vld [vmem:[#allocation3 + $0x150] ss:$8 sps:$4 sm:$0xff]  }
  0xaa   : > { %1020 = vmatprep.subr.bf16.mxu0 %v4933_v59  ;;  %1073 = vmatprep.subr.bf16.mxu1 %v4936_v60  ;;  %v5017_v59 = vld [vmem:[#allocation3 + $0x154] ss:$8 sps:$4 sm:$0xff]   ;;  %v5021_v60 = vld [vmem:[#allocation3 + $0x140] ss:$8 sps:$4 sm:$0xff]  }
  0xad   : > { %1021 = vmatpush1.bf16.msra.mxu0 %v4931_v61  ;;  %1074 = vmatpush1.bf16.msra.mxu1 %v4934_v62  ;;  %v5023_v61 = vld [vmem:[#allocation3 + $0x144] ss:$8 sps:$4 sm:$0xff]   ;;  %v5027_v62 = vld [vmem:[#allocation3 + $0x130] ss:$8 sps:$4 sm:$0xff]  }
  0xae   : > { %1022 = vmatprep.subr.bf16.mxu0 %v4939_v63  ;;  %1075 = vmatprep.subr.bf16.mxu1 %v4942_v1  ;;  %v5029_v63 = vld [vmem:[#allocation3 + $0x134] ss:$8 sps:$4 sm:$0xff]   ;;  %v5033_v1 = vld [vmem:[#allocation3 + $0x120] ss:$8 sps:$4 sm:$0xff]  }
  0xb1   : > { %1023 = vmatpush1.bf16.msra.mxu0 %v4937_v2  ;;  %1076 = vmatpush1.bf16.msra.mxu1 %v4940_v3  ;;  %v5035_v2 = vld [vmem:[#allocation3 + $0x124] ss:$8 sps:$4 sm:$0xff]   ;;  %v5039_v3 = vld [vmem:[#allocation3 + $0x110] ss:$8 sps:$4 sm:$0xff]  }
  0xb2   : > { %1024 = vmatprep.subr.bf16.mxu0 %v4945_v4  ;;  %1077 = vmatprep.subr.bf16.mxu1 %v4948_v5  ;;  %v5041_v4 = vld [vmem:[#allocation3 + $0x114] ss:$8 sps:$4 sm:$0xff]  }
  0xb5   : > { %1025 = vmatpush1.bf16.msra.mxu0 %v4943_v6  ;;  %1078 = vmatpush1.bf16.msra.mxu1 %v4946_v7 }
  0xb6   : > { %1315 = vmatprep.subr.bf16.mxu0 %v4951_v10  ;;  %1368 = vmatprep.subr.bf16.mxu1 %v4954_v11 }
  0xb8   : > { %1043 = vmatmul.mubr.bf16.vlgmr.msra.gmra.mxu0 %v511_v12  ;;  %1096 = vmatmul.mubr.bf16.vlgmr.msra.gmra.mxu1 %v511_v12 }
  0xb9   : > { %1316 = vmatpush1.bf16.msra.mxu0 %v4949_v13  ;;  %1369 = vmatpush1.bf16.msra.mxu1 %v4952_v14 }
  0xba   : > { %1317 = vmatprep.subr.bf16.mxu0 %v4957_v15  ;;  %1370 = vmatprep.subr.bf16.mxu1 %v4960_v16 }
  0xbb   : > { %1052 = vmatprep.mubr.bf16.mxu0 %v6297_v0  ;;  %1105 = vmatprep.mubr.bf16.mxu1 %v6297_v0 }
  0xbd   : > { %1318 = vmatpush1.bf16.msra.mxu0 %v4955_v17  ;;  %1371 = vmatpush1.bf16.msra.mxu1 %v4958_v18 }
  0xbe   : > { %1319 = vmatprep.subr.bf16.mxu0 %v4963_v21  ;;  %1372 = vmatprep.subr.bf16.mxu1 %v4966_v22 }
  0xc0   : > { %1053 = vmatmul.mubr.bf16.gmra.mxu0 %v512_v25  ;;  %1106 = vmatmul.mubr.bf16.gmra.mxu1 %v512_v25 }
  0xc1   : > { %1320 = vmatpush1.bf16.msra.mxu0 %v4961_v23  ;;  %1373 = vmatpush1.bf16.msra.mxu1 %v4964_v24 }
  0xc2   : > { %1321 = vmatprep.subr.bf16.mxu0 %v4969_v26  ;;  %1374 = vmatprep.subr.bf16.mxu1 %v4972_v27 }
  0xc3   : > { %1347 = vmatprep.mubr.bf16.mxu0 %v6297_v0  ;;  %1400 = vmatprep.mubr.bf16.mxu1 %v6297_v0 }
  0xc5   : > { %1322 = vmatpush1.bf16.msra.mxu0 %v4967_v28  ;;  %1375 = vmatpush1.bf16.msra.mxu1 %v4970_v29 }
  0xc6   : > { %1323 = vmatprep.subr.bf16.mxu0 %v4975_v30  ;;  %1376 = vmatprep.subr.bf16.mxu1 %v4978_v31 }
  0xc9   : > { %1324 = vmatpush1.bf16.msra.mxu0 %v4973_v32  ;;  %1377 = vmatpush1.bf16.msra.mxu1 %v4976_v33 }
  0xca   : > { %1325 = vmatprep.subr.bf16.mxu0 %v4981_v34  ;;  %1378 = vmatprep.subr.bf16.mxu1 %v4984_v35 }
  0xcd   : > { %1326 = vmatpush1.bf16.msra.mxu0 %v4979_v36  ;;  %1379 = vmatpush1.bf16.msra.mxu1 %v4982_v37  ;;  %v6126_v37 = vshrl.u32 %v1439_v52, 7 }
  0xce   : > { %1327 = vmatprep.subr.bf16.mxu0 %v4987_v38  ;;  %1380 = vmatprep.subr.bf16.mxu1 %v4990_v39 }
  0xcf   : > { %6328 = vst [vmem:[#allocation23_spill] sm:$0xff] %v6126_v37 }
  0xd1   : > { %1328 = vmatpush1.bf16.msra.mxu0 %v4985_v40  ;;  %1381 = vmatpush1.bf16.msra.mxu1 %v4988_v41 }
  0xd2   : > { %1329 = vmatprep.subr.bf16.mxu0 %v4993_v42  ;;  %1382 = vmatprep.subr.bf16.mxu1 %v4996_v43  ;;  %v6129_v42 = vsub.s32 0, %v6126_v37  ;;  %v1449_v43 = vsub.s32 2, %v6126_v37 }
  0xd4   : > { %6329 = vst [vmem:[#allocation24_spill] sm:$0xff] %v6129_v42  ;;  %v6142_v52 = vrot.slane %v1437_v46, %v1449_v43 }
  0xd5   : > { %1330 = vmatpush1.bf16.msra.mxu0 %v4991_v44  ;;  %1383 = vmatpush1.bf16.msra.mxu1 %v4994_v45  ;;  %v6133_v44 = vsub.s32 1, %v6126_v37  ;;  %v1453_v45 = vsub.s32 3, %v6126_v37 }
  0xd6   : > { %1975 = vmatprep.subr.bf16.mxu0 %v5005_v55  ;;  %6331 = vst [vmem:[#allocation26_spill] sm:$0xff] %v6142_v52 }
  0xd7   : > { %6330 = vst [vmem:[#allocation25_spill] sm:$0xff] %v6133_v44  ;;  %v1454_v55 = vrot.slane %v1437_v46, %v1453_v45 }
  0xd8   : > { %1348 = vmatmul.mubr.bf16.vlgmr.msra.gmra.mxu0 %v1120_v48  ;;  %1401 = vmatmul.mubr.bf16.vlgmr.msra.gmra.mxu1 %v1120_v48 }
  0xd9   : > { %1357 = vmatprep.mubr.bf16.mxu0 %v6297_v0  ;;  %1410 = vmatprep.mubr.bf16.mxu1 %v6297_v0 }
  0xda   : > { %1976 = vmatpush1.bf16.msra.mxu0 %v5003_v54  ;;  %v1446_v54 = vrot.slane %v1437_v46, %v6133_v44 }
  0xdb   : > { %1977 = vmatprep.subr.bf16.mxu0 %v5011_v57 }
  0xde   : > { %1978 = vmatpush1.bf16.msra.mxu0 %v5009_v56 }
  0xdf   : > { %1979 = vmatprep.subr.bf16.mxu0 %v5017_v59 }
  0xe0   : > { %1358 = vmatmul.mubr.bf16.gmra.mxu0 %v1121_v51  ;;  %1411 = vmatmul.mubr.bf16.gmra.mxu1 %v1121_v51  ;;  %v6140_v51 = vrot.slane %v1437_v46, %v6129_v42 }
  0xe1   : > { %1572 = vmatprep.mubr.f32.mxu1 %v6299_v53 }
  0xe2   : > { %1980 = vmatpush1.bf16.msra.mxu0 %v5015_v58 }
  0xe3   : > { %1981 = vmatprep.subr.bf16.mxu0 %v5023_v61 }
  0xe6   : > { %1982 = vmatpush1.bf16.msra.mxu0 %v5021_v60 }
  0xe7   : > { %1983 = vmatprep.subr.bf16.mxu0 %v5029_v63 }
  0xea   : > { %1984 = vmatpush1.bf16.msra.mxu0 %v5027_v62 }
  0xeb   : > { %1985 = vmatprep.subr.bf16.mxu0 %v5035_v2 }
  0xee   : > { %1986 = vmatpush1.bf16.msra.mxu0 %v5033_v1 }
  0xef   : > { %1987 = vmatprep.subr.bf16.mxu0 %v5041_v4 }
  0xf2   : > { %1988 = vmatpush1.bf16.msra.mxu0 %v5039_v3 }
 0x158   : > { %v778_v5 = vpop.f32.mrf.mxu0  ;;  %v831_v6 = vpop.f32.mrf.mxu1 }
 0x15a   : > { %v780_v7 = vpop.f32.mrf.mxu0  ;;  %v833_v8 = vpop.f32.mrf.mxu1 }
 0x15c   : > { %v782_v9 = vpop.f32.mrf.mxu0  ;;  %v835_v10 = vpop.f32.mrf.mxu1 }
 0x15e   : > { %v784_v11 = vpop.f32.mrf.mxu0  ;;  %v837_v12 = vpop.f32.mrf.mxu1 }
 0x160   : > { %v788_v13 = vpop.f32.mrf.mxu0  ;;  %v841_v14 = vpop.f32.mrf.mxu1 }
 0x162   : > { %v790_v15 = vpop.f32.mrf.mxu0  ;;  %v843_v16 = vpop.f32.mrf.mxu1 }
 0x164   : > { %v792_v17 = vpop.f32.mrf.mxu0  ;;  %v845_v18 = vpop.f32.mrf.mxu1 }
 0x166   : > { %v794_v19 = vpop.f32.mrf.mxu0  ;;  %v847_v20 = vpop.f32.mrf.mxu1 }
 0x178   : > { %v1044_v21 = vpop.f32.mrf.mxu0  ;;  %v1097_v22 = vpop.f32.mrf.mxu1 }
 0x179   : > { %v1045_v56 = vadd.f32 %v1044_v21, %v778_v5  ;;  %v1098_v57 = vadd.f32 %v1097_v22, %v831_v6 }
 0x17a   : > { %v1046_v23 = vpop.f32.mrf.mxu0  ;;  %v1099_v24 = vpop.f32.mrf.mxu1 }
 0x17b   : > { %v1047_v58 = vadd.f32 %v1046_v23, %v780_v7  ;;  %v1100_v59 = vadd.f32 %v1099_v24, %v833_v8 }
 0x17c   : > { %v1048_v25 = vpop.f32.mrf.mxu0  ;;  %v1101_v26 = vpop.f32.mrf.mxu1 }
 0x17d   : > { %v1049_v62 = vadd.f32 %v1048_v25, %v782_v9  ;;  %v1102_v63 = vadd.f32 %v1101_v26, %v835_v10 }
 0x17e   : > { %v1050_v27 = vpop.f32.mrf.mxu0  ;;  %v1103_v28 = vpop.f32.mrf.mxu1 }
 0x17f   : > { %v1051_v1 = vadd.f32 %v1050_v27, %v784_v11  ;;  %v1104_v2 = vadd.f32 %v1103_v28, %v837_v12 }
 0x180   : > { %v1054_v29 = vpop.f32.mrf.mxu0  ;;  %v1107_v30 = vpop.f32.mrf.mxu1 }
 0x181   : > { %v1055_v3 = vadd.f32 %v1054_v29, %v788_v13  ;;  %v1108_v4 = vadd.f32 %v1107_v30, %v841_v14 }
 0x182   : > { %v1056_v31 = vpop.f32.mrf.mxu0  ;;  %v1109_v32 = vpop.f32.mrf.mxu1 }
 0x183   : > { %v1057_v0 = vadd.f32 %v1056_v31, %v790_v15  ;;  %v1110_v53 = vadd.f32 %v1109_v32, %v843_v16 }
 0x184   : > { %v1058_v33 = vpop.f32.mrf.mxu0  ;;  %v1111_v34 = vpop.f32.mrf.mxu1 }
 0x185   : > { %v1059_v42 = vadd.f32 %v1058_v33, %v792_v17  ;;  %v1112_v52 = vadd.f32 %v1111_v34, %v845_v18 }
 0x186   : > { %v1060_v35 = vpop.f32.mrf.mxu0  ;;  %v1113_v36 = vpop.f32.mrf.mxu1 }
 0x187   : > { %v1061_v44 = vadd.f32 %v1060_v35, %v794_v19  ;;  %v1114_v45 = vadd.f32 %v1113_v36, %v847_v20 }
 0x198   : > { %v1349_v38 = vpop.f32.mrf.mxu0  ;;  %v1402_v39 = vpop.f32.mrf.mxu1 }
 0x199   : > { %v1421_v5 = vadd.f32 %v1349_v38, %v1045_v56  ;;  %v1423_v6 = vadd.f32 %v1402_v39, %v1098_v57 }
 0x19a   : > { %v1351_v40 = vpop.f32.mrf.mxu0  ;;  %v1404_v41 = vpop.f32.mrf.mxu1 }
 0x19b   : > { %v1422_v9 = vadd.f32 %v1351_v40, %v1047_v58  ;;  %v1424_v17 = vadd.f32 %v1404_v41, %v1100_v59  ;;  %v1459_v46 = vadd.f32 %v6140_v51, %v1421_v5  ;;  %v4999_v5 = vld [vmem:[#allocation3 + $0x74] ss:$8 sps:$4 sm:$0xff]  }
 0x19c   : > { %v1353_v47 = vpop.f32.mrf.mxu0  ;;  %v1406_v48 = vpop.f32.mrf.mxu1 }
 0x19d   : > { %v1425_v13 = vadd.f32 %v1353_v47, %v1049_v62  ;;  %v1427_v18 = vadd.f32 %v1406_v48, %v1102_v63  ;;  %v1460_v28 = vadd.f32 %v1446_v54, %v1422_v9  ;;  %v1462_v40 = vadd.f32 %v1454_v55, %v1424_v17  ;;  %v5008_v9 = vld [vmem:[#allocation3 + $0x54] ss:$8 sps:$4 sm:$0xff]   ;;  %v5038_v17 = vld [vmem:[#allocation3 + $0x4] ss:$8 sps:$4 sm:$0xff]  }
 0x19e   : > { %v1355_v49 = vpop.f32.mrf.mxu0  ;;  %v1408_v50 = vpop.f32.mrf.mxu1 }
 0x19f   : > { %v1426_v14 = vadd.f32 %v1355_v49, %v1051_v1  ;;  %v1428_v15 = vadd.f32 %v1408_v50, %v1104_v2  ;;  %v1463_v32 = vadd.f32 %v6140_v51, %v1425_v13  ;;  %v1476_v59 = vmax.f32 %v1460_v28, 0.0  ;;  %v5020_v13 = vld [vmem:[#allocation3 + $0x34] ss:$8 sps:$4 sm:$0xff]  }
 0x1a0   : > { %v1359_v60 = vpop.f32.mrf.mxu0  ;;  %v1412_v61 = vpop.f32.mrf.mxu1  ;;  %v5056_v28 = vld [vmem:[#allocation3 + $0xd4] ss:$8 sps:$4 sm:$0xff]  }
 0x1a1   : > { %v1429_v10 = vadd.f32 %v1359_v60, %v1055_v3  ;;  %v1431_v11 = vadd.f32 %v1412_v61, %v1108_v4  ;;  %v1464_v33 = vadd.f32 %v1446_v54, %v1426_v14  ;;  %v1466_v34 = vadd.f32 %v1454_v55, %v1428_v15  ;;  %v1499_v4 = vld [vmem:[%s6281_s3] sm:$0xff]  ;;  %v5026_v15 = vld [vmem:[#allocation3 + $0x24] ss:$8 sps:$4 sm:$0xff]  }
 0x1a2   : > { %v1361_v37 = vpop.f32.mrf.mxu0  ;;  %v1414_v43 = vpop.f32.mrf.mxu1  ;;  %v1479_v56 = vmax.f32 %v1463_v32, 0.0  ;;  %v1478_v60 = vmax.f32 %v1462_v40, 0.0  ;;  %v5018_v14 = vld [vmem:[#allocation3 + $0x30] ss:$8 sps:$4 sm:$0xff]   ;;  %v5062_v32 = vld [vmem:[#allocation3 + $0xc4] ss:$8 sps:$4 sm:$0xff]  }
 0x1a3   : > { %v1430_v7 = vadd.f32 %v1361_v37, %v1057_v0  ;;  %v1432_v8 = vadd.f32 %v1414_v43, %v1110_v53  ;;  %v6332_v53 = vld [vmem:[#allocation26_spill] sm:$0xff]  ;;  %v1467_v29 = vadd.f32 %v6140_v51, %v1429_v10  ;;  %v1480_v50 = vmax.f32 %v1464_v33, 0.0  ;;  %v5057_v33 = vld [vmem:[#allocation3 + $0x1e0] ss:$8 sps:$4 sm:$0xff]  }
 0x1a4   : > { %v1363_v21 = vpop.f32.mrf.mxu0  ;;  %v1416_v22 = vpop.f32.mrf.mxu1  ;;  %v1469_v30 = vadd.f32 %v6332_v53, %v1431_v11  ;;  %v1465_v36 = vadd.f32 %v6332_v53, %v1427_v18  ;;  %v1461_v47 = vadd.f32 %v6332_v53, %v1423_v6  ;;  %v1492_v2 = vmax.f32 %v1476_v59, %v1478_v60  ;;  %v4453_v6 = vld [vmem:[%s6281_s3 + $0x10] sm:$0xff]  ;;  %v5006_v10 = vld [vmem:[#allocation3 + $0x50] ss:$8 sps:$4 sm:$0xff]   ;;  %v5095_v60 = vld [vmem:[#allocation3 + $0x274] ss:$8 sps:$4 sm:$0xff]  }
 0x1a5   : > { %v1433_v12 = vadd.f32 %v1363_v21, %v1059_v42  ;;  %v1435_v16 = vadd.f32 %v1416_v22, %v1112_v52  ;;  %v1468_v25 = vadd.f32 %v1446_v54, %v1430_v7  ;;  %v1470_v0 = vadd.f32 %v1454_v55, %v1432_v8  ;;  %v4997_v7 = vld [vmem:[#allocation3 + $0x70] ss:$8 sps:$4 sm:$0xff]   ;;  %v5002_v8 = vld [vmem:[#allocation3 + $0x64] ss:$8 sps:$4 sm:$0xff]   ;;  %v5000_v22 = vld [vmem:[#allocation3 + $0x60] ss:$8 sps:$4 sm:$0xff]  }
 0x1a6   : > { %v1365_v23 = vpop.f32.mrf.mxu0  ;;  %v1418_v24 = vpop.f32.mrf.mxu1  ;;  %v1483_v48 = vmax.f32 %v1467_v29, 0.0  ;;  %v1485_v49 = vmax.f32 %v1469_v30, 0.0  ;;  %v1482_v52 = vmax.f32 %v1466_v34, 0.0  ;;  %v1481_v57 = vmax.f32 %v1465_v36, 0.0  ;;  %v4454_v21 = vld [vmem:[%s6281_s3 + $0x18] sm:$0xff] }
 0x1a7   : > { %v1471_v19 = vadd.f32 %v6140_v51, %v1433_v12  ;;  %v1434_v20 = vadd.f32 %v1365_v23, %v1061_v44  ;;  %v1473_v26 = vadd.f32 %v6332_v53, %v1435_v16  ;;  %v1436_v27 = vadd.f32 %v1418_v24, %v1114_v45  ;;  %v1500_v45 = vld [vmem:[%s6281_s3 + $0x8] sm:$0xff]  ;;  %v5014_v11 = vld [vmem:[#allocation3 + $0x44] ss:$8 sps:$4 sm:$0xff]   ;;  %v5012_v12 = vld [vmem:[#allocation3 + $0x40] ss:$8 sps:$4 sm:$0xff]  }
 0x1a8   : > { %v1484_v41 = vmax.f32 %v1468_v25, 0.0  ;;  %v1486_v42 = vmax.f32 %v1470_v0, 0.0  ;;  %v1477_v62 = vmax.f32 %v1461_v47, 0.0  ;;  %v1495_v63 = vmax.f32 %v1483_v48, %v1485_v49  ;;  %v5024_v16 = vld [vmem:[#allocation3 + $0x20] ss:$8 sps:$4 sm:$0xff]  }
 0x1a9   : > { %v1472_v31 = vadd.f32 %v1446_v54, %v1434_v20  ;;  %v1474_v35 = vadd.f32 %v1454_v55, %v1436_v27  ;;  %v1487_v37 = vmax.f32 %v1471_v19, 0.0  ;;  %v1489_v38 = vmax.f32 %v1473_v26, 0.0  ;;  %v5032_v23 = vld [vmem:[#allocation3 + $0x14] ss:$8 sps:$4 sm:$0xff]   ;;  %v5030_v24 = vld [vmem:[#allocation3 + $0x10] ss:$8 sps:$4 sm:$0xff]  }
 0x1aa   : > { %v1496_v61 = vmax.f32 %v1484_v41, %v1486_v42  ;;  %v1475_v55 = vmax.f32 %v1459_v46, 0.0  ;;  %v1494_v51 = vmax.f32 %v1480_v50, %v1482_v52  ;;  %v1493_v1 = vmax.f32 %v1479_v56, %v1481_v57  ;;  %v5036_v18 = vld [vmem:[#allocation3] ss:$8 sps:$4 sm:$0xff]   ;;  %v5044_v19 = vld [vmem:[#allocation3 + $0xf4] ss:$8 sps:$4 sm:$0xff]  }
 0x1ab   : > { %v1488_v39 = vmax.f32 %v1472_v31, 0.0  ;;  %v1490_v44 = vmax.f32 %v1474_v35, 0.0  ;;  %v1497_v58 = vmax.f32 %v1487_v37, %v1489_v38  ;;  %v6333_v43 = vmov 0.0   ;;  %v5042_v20 = vld [vmem:[#allocation3 + $0xf0] ss:$8 sps:$4 sm:$0xff]  }
 0x1ac   : > { %v1491_v3 = vmax.f32 %v1475_v55, %v1477_v62  ;;  %v5047_v25 = vld [vmem:[#allocation3 + $0x104] ss:$8 sps:$4 sm:$0xff]   ;;  %v5045_v53 = vld [vmem:[#allocation3 + $0x100] ss:$8 sps:$4 sm:$0xff]   ;;  %v5053_v27 = vld [vmem:[#allocation3 + $0x1f4] ss:$8 sps:$4 sm:$0xff]  }
 0x1ad   : > { %v1498_v54 = vmax.f32 %v1488_v39, %v1490_v44  ;;  %v5050_v0 = vld [vmem:[#allocation3 + $0xe4] ss:$8 sps:$4 sm:$0xff]   ;;  %v5048_v26 = vld [vmem:[#allocation3 + $0xe0] ss:$8 sps:$4 sm:$0xff]   ;;  %1989 = vmatprep.subr.bf16.mxu0 %v5047_v25  ;;  %v5051_v29 = vld [vmem:[#allocation3 + $0x1f0] ss:$8 sps:$4 sm:$0xff]  }
 0x1ae   : > { %1990 = vmatpush1.bf16.msra.mxu0 %v5045_v53  ;;  %v5054_v30 = vld [vmem:[#allocation3 + $0xd0] ss:$8 sps:$4 sm:$0xff]   ;;  %v5059_v31 = vld [vmem:[#allocation3 + $0x1e4] ss:$8 sps:$4 sm:$0xff]   ;;  %v5060_v34 = vld [vmem:[#allocation3 + $0xc0] ss:$8 sps:$4 sm:$0xff]  }
 0x1af   : > { %1532 = vmatprep.subr.mxu1 %v1498_v54  ;;  %1991 = vmatprep.subr.bf16.mxu0 %v5053_v27  ;;  %v5065_v35 = vld [vmem:[#allocation3 + $0x1d4] ss:$8 sps:$4 sm:$0xff]   ;;  %v5063_v37 = vld [vmem:[#allocation3 + $0x1d0] ss:$8 sps:$4 sm:$0xff]   ;;  %v5071_v39 = vld [vmem:[#allocation3 + $0x1c4] ss:$8 sps:$4 sm:$0xff]  }
 0x1b0   : > { %1533 = vmatpush1.msra.mxu1 %v1497_v58  ;;  %v5068_v36 = vld [vmem:[#allocation3 + $0xb4] ss:$8 sps:$4 sm:$0xff]   ;;  %v5066_v38 = vld [vmem:[#allocation3 + $0xb0] ss:$8 sps:$4 sm:$0xff]   ;;  %v5074_v40 = vld [vmem:[#allocation3 + $0xa4] ss:$8 sps:$4 sm:$0xff]  }
 0x1b1   : > { %1534 = vmatprep.subr.mxu1 %v1496_v61  ;;  %v5069_v41 = vld [vmem:[#allocation3 + $0x1c0] ss:$8 sps:$4 sm:$0xff]   ;;  %v5077_v44 = vld [vmem:[#allocation3 + $0x1b4] ss:$8 sps:$4 sm:$0xff]   ;;  %v5075_v47 = vld [vmem:[#allocation3 + $0x1b0] ss:$8 sps:$4 sm:$0xff]  }
 0x1b2   : > { %1535 = vmatpush1.msra.mxu1 %v1495_v63  ;;  %1992 = vmatpush2.bf16.msra.mxu0 %v5051_v29  ;;  %v5072_v42 = vld [vmem:[#allocation3 + $0xa0] ss:$8 sps:$4 sm:$0xff]   ;;  %v5080_v46 = vld [vmem:[#allocation3 + $0x94] ss:$8 sps:$4 sm:$0xff]   ;;  %v5078_v48 = vld [vmem:[#allocation3 + $0x90] ss:$8 sps:$4 sm:$0xff]  }
 0x1b3   : > { %1536 = vmatprep.subr.mxu1 %v1494_v51  ;;  %1993 = vmatprep.subr.bf16.mxu0 %v5059_v31  ;;  %v5081_v49 = vld [vmem:[#allocation3 + $0x1a0] ss:$8 sps:$4 sm:$0xff]   ;;  %v5083_v50 = vld [vmem:[#allocation3 + $0x1a4] ss:$8 sps:$4 sm:$0xff]   ;;  %v5089_v56 = vld [vmem:[#allocation3 + $0x194] ss:$8 sps:$4 sm:$0xff]  }
 0x1b4   : > { %1537 = vmatpush1.msra.mxu1 %v1493_v1  ;;  %v5084_v52 = vld [vmem:[#allocation3 + $0x80] ss:$8 sps:$4 sm:$0xff]   ;;  %v5087_v57 = vld [vmem:[#allocation3 + $0x190] ss:$8 sps:$4 sm:$0xff]  }
 0x1b5   : > { %1538 = vmatprep.subr.mxu1 %v1492_v2  ;;  %v5090_v59 = vld [vmem:[#allocation3 + $0x180] ss:$8 sps:$4 sm:$0xff]  }
 0x1b6   : > { %1539 = vmatpush1.msra.mxu1 %v1491_v3  ;;  %1994 = vmatpush2.bf16.msra.mxu0 %v5057_v33 }
 0x1b7   : > { %4451 = vmatmul.mubr.msk.f32.vlgmr.msra.gmra.mxu1 %vm1501_vm1, %v1499_v4  ;;  %1618 = vmatprep.subr.mxu1 %v1498_v54  ;;  %v5086_v54 = vld [vmem:[#allocation3 + $0x84] ss:$8 sps:$4 sm:$0xff]  }
 0x1b8   : > { %1619 = vmatpush1.msra.mxu1 %v1497_v58  ;;  %1578 = vmatprep.mubr.f32.mxu1 %v6333_v43  ;;  %v5092_v58 = vld [vmem:[#allocation3 + $0x184] ss:$8 sps:$4 sm:$0xff]  }
 0x1b9   : > { %1620 = vmatprep.subr.mxu1 %v1496_v61  ;;  %1995 = vmatprep.subr.bf16.mxu0 %v5065_v35 }
 0x1ba   : > { %1621 = vmatpush1.msra.mxu1 %v1495_v63  ;;  %1996 = vmatpush2.bf16.msra.mxu0 %v5063_v37 }
 0x1bb   : > { %4452 = vmatmul.mubr.msk.f32.gmra.mxu1 %vm1501_vm1, %v1500_v45  ;;  %1622 = vmatprep.subr.mxu1 %v1494_v51 }
 0x1bc   : > { %1623 = vmatpush1.msra.mxu1 %v1493_v1  ;;  %1658 = vmatprep.mubr.f32.mxu1 %v6333_v43 }
 0x1bd   : > { %1624 = vmatprep.subr.mxu1 %v1492_v2  ;;  %1997 = vmatprep.subr.bf16.mxu0 %v5071_v39  ;;  %v5093_v39 = vld [vmem:[#allocation3 + $0x270] ss:$8 sps:$4 sm:$0xff]  }
 0x1be   : > { %1625 = vmatpush1.msra.mxu1 %v1491_v3  ;;  %1998 = vmatpush2.bf16.msra.mxu0 %v5069_v41 }
 0x1bf   : > { %4455 = vmatmul.mubr.msk.f32.vlgmr.msra.gmra.mxu1 %vm1501_vm1, %v4453_v6  ;;  %2178 = vmatprep.subr.bf16.mxu1 %v4999_v5 }
 0x1c0   : > { %1664 = vmatprep.mubr.f32.mxu1 %v6333_v43  ;;  %2179 = vmatpush1.bf16.msra.mxu1 %v4997_v7 }
 0x1c1   : > { %2180 = vmatprep.subr.bf16.mxu1 %v5002_v8  ;;  %1999 = vmatprep.subr.bf16.mxu0 %v5077_v44  ;;  %v5098_v44 = vld [vmem:[#allocation3 + $0x264] ss:$8 sps:$4 sm:$0xff]  }
 0x1c2   : > { %2000 = vmatpush2.bf16.msra.mxu0 %v5075_v47 }
 0x1c3   : > { %4456 = vmatmul.mubr.msk.f32.gmra.mxu1 %vm1501_vm1, %v4454_v21  ;;  %2001 = vmatprep.subr.bf16.mxu0 %v5083_v50  ;;  %v5099_v50 = vld [vmem:[#allocation3 + $0x250] ss:$8 sps:$4 sm:$0xff]  }
 0x1c4   : > { %2181 = vmatpush1.bf16.msra.mxu1 %v5000_v22 }
 0x1c5   : > { %2182 = vmatprep.subr.bf16.mxu1 %v5008_v9 }
 0x1c6   : > { %2002 = vmatpush2.bf16.msra.mxu0 %v5081_v49  ;;  %v5101_v49 = vld [vmem:[#allocation3 + $0x254] ss:$8 sps:$4 sm:$0xff]  }
 0x1c7   : > { %2003 = vmatprep.subr.bf16.mxu0 %v5089_v56  ;;  %v5107_v56 = vld [vmem:[#allocation3 + $0x234] ss:$8 sps:$4 sm:$0xff]  }
 0x1c8   : > { %2183 = vmatpush1.bf16.msra.mxu1 %v5006_v10 }
 0x1c9   : > { %2184 = vmatprep.subr.bf16.mxu1 %v5014_v11 }
 0x1ca   : > { %2004 = vmatpush2.bf16.msra.mxu0 %v5087_v57  ;;  %v5105_v57 = vld [vmem:[#allocation3 + $0x230] ss:$8 sps:$4 sm:$0xff]  }
 0x1cb   : > { %2005 = vmatprep.subr.bf16.mxu0 %v5092_v58  ;;  %v5110_v58 = vld [vmem:[#allocation3 + $0x224] ss:$8 sps:$4 sm:$0xff]  }
 0x1cc   : > { %2185 = vmatpush1.bf16.msra.mxu1 %v5012_v12 }
 0x1cd   : > { %2186 = vmatprep.subr.bf16.mxu1 %v5020_v13 }
 0x1ce   : > { %2006 = vmatpush2.bf16.msra.mxu0 %v5090_v59  ;;  %v5108_v59 = vld [vmem:[#allocation3 + $0x220] ss:$8 sps:$4 sm:$0xff]  }
 0x1cf   : > { %2435 = vmatprep.subr.bf16.mxu0 %v5095_v60  ;;  %v5113_v60 = vld [vmem:[#allocation3 + $0x214] ss:$8 sps:$4 sm:$0xff]  }
 0x1d0   : > { %2187 = vmatpush1.bf16.msra.mxu1 %v5018_v14 }
 0x1d1   : > { %2188 = vmatprep.subr.bf16.mxu1 %v5026_v15 }
 0x1d4   : > { %2189 = vmatpush1.bf16.msra.mxu1 %v5024_v16 }
 0x1d5   : > { %2190 = vmatprep.subr.bf16.mxu1 %v5032_v23 }
 0x1d8   : > { %2191 = vmatpush1.bf16.msra.mxu1 %v5030_v24 }
 0x1d9   : > { %2192 = vmatprep.subr.bf16.mxu1 %v5038_v17 }
 0x1dc   : > { %2193 = vmatpush1.bf16.msra.mxu1 %v5036_v18 }
 0x1dd   : > { %2194 = vmatprep.subr.bf16.mxu1 %v5044_v19 }
 0x1e0   : > { %2195 = vmatpush2.bf16.msra.mxu1 %v5042_v20 }
 0x1e1   : > { %2196 = vmatprep.subr.bf16.mxu1 %v5050_v0 }
 0x1e4   : > { %2197 = vmatpush2.bf16.msra.mxu1 %v5048_v26 }
 0x1e5   : > { %2198 = vmatprep.subr.bf16.mxu1 %v5056_v28 }
 0x1e8   : > { %2199 = vmatpush2.bf16.msra.mxu1 %v5054_v30 }
 0x1e9   : > { %2200 = vmatprep.subr.bf16.mxu1 %v5062_v32 }
 0x1ec   : > { %2201 = vmatpush2.bf16.msra.mxu1 %v5060_v34 }
 0x1ed   : > { %2202 = vmatprep.subr.bf16.mxu1 %v5068_v36 }
 0x1f0   : > { %2203 = vmatpush2.bf16.msra.mxu1 %v5066_v38 }
 0x1f1   : > { %2204 = vmatprep.subr.bf16.mxu1 %v5074_v40 }
 0x1f4   : > { %2205 = vmatpush2.bf16.msra.mxu1 %v5072_v42 }
 0x1f5   : > { %2206 = vmatprep.subr.bf16.mxu1 %v5080_v46 }
 0x1f8   : > { %2207 = vmatpush2.bf16.msra.mxu1 %v5078_v48  ;;  %v5096_v48 = vld [vmem:[#allocation3 + $0x260] ss:$8 sps:$4 sm:$0xff]  }
 0x1f9   : > { %2208 = vmatprep.subr.bf16.mxu1 %v5086_v54  ;;  %v5102_v54 = vld [vmem:[#allocation3 + $0x240] ss:$8 sps:$4 sm:$0xff]  }
 0x1fc   : > { %2209 = vmatpush2.bf16.msra.mxu1 %v5084_v52  ;;  %v5104_v52 = vld [vmem:[#allocation3 + $0x244] ss:$8 sps:$4 sm:$0xff]  }
 0x1fd   : > { %4730 = vmatprep.subr.mxu1 %v6333_v43 }
 0x277   : > { %v1574_v61 = vpop.f32.mrf.mxu1 }
 0x279   : > { %v1576_v55 = vpop.f32.mrf.mxu1 }
 0x27b   : > { %v1580_v62 = vpop.f32.mrf.mxu1 }
 0x27d   : > { %v1582_v63 = vpop.f32.mrf.mxu1 }
 0x27f   : > { %v1660_v51 = vpop.f32.mrf.mxu1 }
 0x280   : > { %v1671_v1 = vmax.f32 %v1574_v61, %v1660_v51  ;;  %v5111_v61 = vld [vmem:[#allocation3 + $0x210] ss:$8 sps:$4 sm:$0xff]  }
 0x281   : > { %v1662_v2 = vpop.f32.mrf.mxu1  ;;  %v5117_v51 = vld [vmem:[#allocation3 + $0x2f0] ss:$8 sps:$4 sm:$0xff]  }
 0x282   : > { %v1689_v3 = vrot.slane %v1671_v1, 7  ;;  %v1672_v4 = vmax.f32 %v1576_v55, %v1662_v2  ;;  %v5116_v55 = vld [vmem:[#allocation3 + $0x204] ss:$8 sps:$4 sm:$0xff]   ;;  %v5120_v2 = vld [vmem:[#allocation3 + $0x2e0] ss:$8 sps:$4 sm:$0xff]  }
 0x283   : > { %v1666_v45 = vpop.f32.mrf.mxu1  ;;  %v5122_v1 = vld [vmem:[#allocation3 + $0x2e4] ss:$8 sps:$4 sm:$0xff]  }
 0x284   : > { %1701 = vst [vmem:[#allocation2] sm:$0xfe] %v1689_v3  ;;  %v1690_v5 = vrot.slane %v1672_v4, 7  ;;  %v1673_v6 = vmax.f32 %v1580_v62, %v1666_v45  ;;  %v5114_v62 = vld [vmem:[#allocation3 + $0x200] ss:$8 sps:$4 sm:$0xff]  }
 0x285   : > { %v1668_v7 = vpop.f32.mrf.mxu1  ;;  %v5123_v4 = vld [vmem:[#allocation3 + $0x2d0] ss:$8 sps:$4 sm:$0xff]   ;;  %v5128_v45 = vld [vmem:[#allocation3 + $0x2c4] ss:$8 sps:$4 sm:$0xff]  }
 0x286   : > { %1702 = vst [vmem:[#allocation2 + $0x8] sm:$0xfe] %v1690_v5  ;;  %v1691_v8 = vrot.slane %v1673_v6, 7  ;;  %v1674_v21 = vmax.f32 %v1582_v63, %v1668_v7  ;;  %v5119_v63 = vld [vmem:[#allocation3 + $0x2f4] ss:$8 sps:$4 sm:$0xff]  }
 0x287   : > { %v5131_v6 = vld [vmem:[#allocation3 + $0x2b4] ss:$8 sps:$4 sm:$0xff]   ;;  %v5129_v7 = vld [vmem:[#allocation3 + $0x2b0] ss:$8 sps:$4 sm:$0xff]  }
 0x288   : > { %v6173_v22 = vsel %vm1688_vm2, %v1689_v3, %v1691_v8  ;;  %1705 = vst [vmem:[#allocation2 + $0x20] sm:$0x1] %v1691_v8  ;;  %v1693_v9 = vrot.slane %v1674_v21, 7  ;;  %v5125_v3 = vld [vmem:[#allocation3 + $0x2d4] ss:$8 sps:$4 sm:$0xff]  }
 0x289   : > { %v5134_v8 = vld [vmem:[#allocation3 + $0x2a4] ss:$8 sps:$4 sm:$0xff]   ;;  %v5132_v21 = vld [vmem:[#allocation3 + $0x2a0] ss:$8 sps:$4 sm:$0xff]  }
 0x28a   : > { %v1694_v10 = vsel %vm1688_vm2, %v1690_v5, %v1693_v9  ;;  %1706 = vst [vmem:[#allocation2 + $0x28] sm:$0x1] %v1693_v9  ;;  %v5126_v5 = vld [vmem:[#allocation3 + $0x2c0] ss:$8 sps:$4 sm:$0xff]   ;;  %v5137_v9 = vld [vmem:[#allocation3 + $0x294] ss:$8 sps:$4 sm:$0xff]  }
 0x28b   : > { %v1745_v11 = vld [vmem:[#allocation2] sm:$0xfe] }
 0x28c   : > { %v1707_v12 = vld [vmem:[#allocation2] sm:$0xff]  ;;  %v1751_v13 = vpack.c.bf16 %v6173_v22, %v1745_v11 }
 0x28d   : > { %v1708_v14 = vld [vmem:[#allocation2 + $0x8] sm:$0xff]  ;;  %v1711_v24 = vpack.c.bf16 %v6173_v22, %v1707_v12  ;;  %v5140_v12 = vld [vmem:[#allocation3 + $0x284] ss:$8 sps:$4 sm:$0xff]  }
 0x28e   : > { %v1746_v15 = vld [vmem:[#allocation2 + $0x8] sm:$0xfe]  ;;  %v1712_v16 = vpack.c.bf16 %v1694_v10, %v1708_v14  ;;  %v1792_v18 = vshll.u32 %v1751_v13, 16  ;;  %v1790_v34 = vshrl.u32 %v1751_v13, 16  ;;  %v2221_v13 = vld [vmem:[#allocation2] sm:$0xfc] }
 0x28f   : > { %v1752_v23 = vpack.c.bf16 %v1694_v10, %v1746_v15  ;;  %v1749_v17 = vld [vmem:[#allocation2 + $0x20] sm:$0x1]  ;;  %v2222_v0 = vld [vmem:[#allocation2 + $0x8] sm:$0xfc]  ;;  %v5138_v15 = vld [vmem:[#allocation3 + $0x280] ss:$8 sps:$4 sm:$0xff]  }
 0x290   : > { %2210 = vmatprep.mubr.bf16.mxu1 %v1712_v16  ;;  %v1753_v20 = vpack.c.bf16 %v1749_v17, %v1749_v17  ;;  %v1794_v29 = vrot.slane %v1792_v18, 1  ;;  %v2226_v33 = vpack.c.bf16 %v1694_v10, %v2222_v0  ;;  %v2223_v10 = vld [vmem:[#allocation2 + $0x20] sm:$0x3]  ;;  %v2225_v16 = vpack.c.bf16 %v6173_v22, %v2221_v13  ;;  %v5152_v0 = vld [vmem:[#allocation9 + $0x164] ss:$8 sps:$4 sm:$0xff]  }
 0x291   : > { %v1804_v19 = vshll.u32 %v1752_v23, 16  ;;  %2211 = vmatmul.mubr.bf16.vlgmr.msra.gmra.mxu1 %v1711_v24  ;;  %v1750_v25 = vld [vmem:[#allocation2 + $0x28] sm:$0x1]  ;;  %v1802_v31 = vshrl.u32 %v1752_v23, 16  ;;  %v2227_v14 = vpack.c.bf16 %v2223_v10, %v2223_v10  ;;  %v6334_v18 = vmov 0  }
 0x292   : > { %v2224_v53 = vld [vmem:[#allocation2 + $0x28] sm:$0x3]  ;;  %v1754_v26 = vpack.c.bf16 %v1750_v25, %v1750_v25  ;;  %v1797_v28 = vshll.u32 %v1753_v20, 16  ;;  %v1795_v40 = vor.u32 %v1794_v29, %v1790_v34  ;;  %v2270_v42 = vrot.slane %v2226_v33, 1  ;;  %4734 = vmatprep.mubr.msk.f32.mxu1 %vm5595_vm5, %v6333_v43  ;;  %v5146_v20 = vld [vmem:[#allocation9 + $0x174] ss:$8 sps:$4 sm:$0xff]  }
 0x293   : > { %v1806_v27 = vrot.slane %v1804_v19, 1  ;;  %v2228_v30 = vpack.c.bf16 %v2224_v53, %v2224_v53  ;;  %v5135_v11 = vld [vmem:[#allocation3 + $0x290] ss:$8 sps:$4 sm:$0xff]   ;;  %v2268_v23 = vrot.slane %v2227_v14, 1  ;;  %v2267_v24 = vrot.slane %v2225_v16, 1 }
 0x294   : > { %v1809_v32 = vshll.u32 %v1754_v26, 16  ;;  %v1799_v35 = vrot.slane %v1797_v28, 1  ;;  %v5144_v19 = vld [vmem:[#allocation9 + $0x170] ss:$8 sps:$4 sm:$0xff]   ;;  %v5150_v25 = vld [vmem:[#allocation9 + $0x160] ss:$8 sps:$4 sm:$0xff]  }
 0x295   : > { %v1807_v36 = vor.u32 %v1806_v27, %v1802_v31  ;;  %v2271_v38 = vrot.slane %v2228_v30, 1  ;;  %v2269_v17 = vsel %vm2266_vm4, %v2267_v24, %v2268_v23  ;;  %v5156_v22 = vld [vmem:[#allocation9 + $0x150] ss:$8 sps:$4 sm:$0xff]   ;;  %v5158_v53 = vld [vmem:[#allocation9 + $0x154] ss:$8 sps:$4 sm:$0xff]  }
 0x296   : > { %v1811_v37 = vrot.slane %v1809_v32, 1  ;;  %v1800_v46 = vsel %vm1788_vm3, %v1795_v40, %v1799_v35  ;;  %v5162_v26 = vld [vmem:[#allocation9 + $0x140] ss:$8 sps:$4 sm:$0xff]   ;;  %v5164_v27 = vld [vmem:[#allocation9 + $0x144] ss:$8 sps:$4 sm:$0xff]  }
 0x297   : > { %v2272_v47 = vsel %vm2266_vm4, %v2270_v42, %v2271_v38  ;;  %v5168_v28 = vld [vmem:[#allocation9 + $0x130] ss:$8 sps:$4 sm:$0xff]   ;;  %v5170_v29 = vld [vmem:[#allocation9 + $0x134] ss:$8 sps:$4 sm:$0xff]   ;;  %v5174_v30 = vld [vmem:[#allocation9 + $0x120] ss:$8 sps:$4 sm:$0xff]  }
 0x298   : > { %v1812_v41 = vsel %vm1788_vm3, %v1807_v36, %v1811_v37  ;;  %v5176_v31 = vld [vmem:[#allocation9 + $0x124] ss:$8 sps:$4 sm:$0xff]   ;;  %v5147_v10 = vld [vmem:[#allocation9 + $0x60] ss:$8 sps:$4 sm:$0xff]   ;;  %v5179_v24 = vld [vmem:[#allocation9 + $0x14] ss:$8 sps:$4 sm:$0xff]  }
 0x299   : > { %2007 = vmatprep.mubr.bf16.mxu0 %v1812_v41  ;;  %v2482_v41 = vld [vmem:[#allocation6] sm:$0x3]  ;;  %v5159_v14 = vld [vmem:[#allocation9 + $0x40] ss:$8 sps:$4 sm:$0xff]  }
 0x29a   : > { %2008 = vmatmul.mubr.bf16.vlgmr.msra.gmra.mxu0 %v1800_v46  ;;  %v5161_v13 = vld [vmem:[#allocation9 + $0x44] ss:$8 sps:$4 sm:$0xff]   ;;  %v5171_v23 = vld [vmem:[#allocation9 + $0x20] ss:$8 sps:$4 sm:$0xff]  }
 0x29b   : > { %2436 = vmatpush1.bf16.msra.mxu0 %v5093_v39  ;;  %2467 = vmatprep.mubr.bf16.mxu0 %v2272_v47  ;;  %v5173_v16 = vld [vmem:[#allocation9 + $0x24] ss:$8 sps:$4 sm:$0xff]  }
 0x29c   : > { %2437 = vmatprep.subr.bf16.mxu0 %v5098_v44 }
 0x29f   : > { %2438 = vmatpush1.bf16.msra.mxu0 %v5096_v48  ;;  %v6335_v48 = vld [vmem:[#allocation25_spill] sm:$0xff] }
 0x2a0   : > { %2439 = vmatprep.subr.bf16.mxu0 %v5101_v49  ;;  %v2491_v49 = vrot.slane %v2482_v41, %v6335_v48 }
 0x2a3   : > { %2440 = vmatpush1.bf16.msra.mxu0 %v5099_v50 }
 0x2a4   : > { %2441 = vmatprep.subr.bf16.mxu0 %v5104_v52 }
 0x2a7   : > { %2442 = vmatpush1.bf16.msra.mxu0 %v5102_v54 }
 0x2a8   : > { %2443 = vmatprep.subr.bf16.mxu0 %v5107_v56 }
 0x2ab   : > { %2444 = vmatpush1.bf16.msra.mxu0 %v5105_v57  ;;  %v6336_v57 = vld [vmem:[#allocation24_spill] sm:$0xff] }
 0x2ac   : > { %2445 = vmatprep.subr.bf16.mxu0 %v5110_v58  ;;  %v2487_v58 = vrot.slane %v2482_v41, %v6336_v57  ;;  %v5198_v41 = vld [vmem:[#allocation9 + $0x260] ss:$8 sps:$4 sm:$0xff]  }
 0x2af   : > { %2446 = vmatpush1.bf16.msra.mxu0 %v5108_v59 }
 0x2b0   : > { %2447 = vmatprep.subr.bf16.mxu0 %v5113_v60 }
 0x2b3   : > { %2448 = vmatpush1.bf16.msra.mxu0 %v5111_v61 }
 0x2b4   : > { %2449 = vmatprep.subr.bf16.mxu0 %v5116_v55 }
 0x2b7   : > { %2450 = vmatpush1.bf16.msra.mxu0 %v5114_v62 }
 0x2b8   : > { %2451 = vmatprep.subr.bf16.mxu0 %v5119_v63 }
 0x2bb   : > { %2452 = vmatpush2.bf16.msra.mxu0 %v5117_v51 }
 0x2bc   : > { %2453 = vmatprep.subr.bf16.mxu0 %v5122_v1 }
 0x2bf   : > { %2454 = vmatpush2.bf16.msra.mxu0 %v5120_v2 }
 0x2c0   : > { %2455 = vmatprep.subr.bf16.mxu0 %v5125_v3 }
 0x2c3   : > { %2456 = vmatpush2.bf16.msra.mxu0 %v5123_v4 }
 0x2c4   : > { %2457 = vmatprep.subr.bf16.mxu0 %v5128_v45 }
 0x2c7   : > { %2458 = vmatpush2.bf16.msra.mxu0 %v5126_v5 }
 0x2c8   : > { %2459 = vmatprep.subr.bf16.mxu0 %v5131_v6  ;;  %v2504_v6 = vld [vmem:[#allocation8] sm:$0xff] }
 0x2cb   : > { %2460 = vmatpush2.bf16.msra.mxu0 %v5129_v7  ;;  %v5143_v7 = vld [vmem:[#allocation9 + $0x74] ss:$8 sps:$4 sm:$0xff]  }
 0x2cc   : > { %2461 = vmatprep.subr.bf16.mxu0 %v5134_v8  ;;  %v2580_v8 = vld [vmem:[#allocation8 + $0x8] sm:$0xff] }
 0x2cf   : > { %2462 = vmatpush2.bf16.msra.mxu0 %v5132_v21  ;;  %v5141_v21 = vld [vmem:[#allocation9 + $0x70] ss:$8 sps:$4 sm:$0xff]  }
 0x2d0   : > { %2463 = vmatprep.subr.bf16.mxu0 %v5137_v9  ;;  %v5149_v9 = vld [vmem:[#allocation9 + $0x64] ss:$8 sps:$4 sm:$0xff]  }
 0x2d3   : > { %2464 = vmatpush2.bf16.msra.mxu0 %v5135_v11  ;;  %v5155_v11 = vld [vmem:[#allocation9 + $0x54] ss:$8 sps:$4 sm:$0xff]  }
 0x2d4   : > { %2465 = vmatprep.subr.bf16.mxu0 %v5140_v12  ;;  %v5153_v12 = vld [vmem:[#allocation9 + $0x50] ss:$8 sps:$4 sm:$0xff]  }
 0x2d7   : > { %2466 = vmatpush2.bf16.msra.mxu0 %v5138_v15  ;;  %v5167_v15 = vld [vmem:[#allocation9 + $0x34] ss:$8 sps:$4 sm:$0xff]  }
 0x2d8   : > { %3075 = vmatprep.subr.bf16.mxu0 %v5146_v20  ;;  %v5180_v20 = vld [vmem:[#allocation9 + $0x110] ss:$8 sps:$4 sm:$0xff]  }
 0x2da   : > { %2468 = vmatmul.mubr.bf16.vlgmr.msra.gmra.mxu0 %v2269_v17  ;;  %v5177_v17 = vld [vmem:[#allocation9 + $0x10] ss:$8 sps:$4 sm:$0xff]  }
 0x2db   : > { %3107 = vmatprep.mubr.bf16.mxu0 %v6334_v18  ;;  %3076 = vmatpush1.bf16.msra.mxu0 %v5144_v19  ;;  %v5182_v19 = vld [vmem:[#allocation9 + $0x114] ss:$8 sps:$4 sm:$0xff]  }
 0x2dc   : > { %3077 = vmatprep.subr.bf16.mxu0 %v5152_v0  ;;  %v5183_v0 = vld [vmem:[#allocation9] ss:$8 sps:$4 sm:$0xff]  }
 0x2df   : > { %3078 = vmatpush1.bf16.msra.mxu0 %v5150_v25  ;;  %v5185_v25 = vld [vmem:[#allocation9 + $0x4] ss:$8 sps:$4 sm:$0xff]  }
 0x2e0   : > { %3079 = vmatprep.subr.bf16.mxu0 %v5158_v53  ;;  %v5186_v53 = vld [vmem:[#allocation9 + $0x100] ss:$8 sps:$4 sm:$0xff]  }
 0x2e3   : > { %3080 = vmatpush1.bf16.msra.mxu0 %v5156_v22  ;;  %v5188_v22 = vld [vmem:[#allocation9 + $0x104] ss:$8 sps:$4 sm:$0xff]  }
 0x2e4   : > { %3081 = vmatprep.subr.bf16.mxu0 %v5164_v27  ;;  %v5194_v27 = vld [vmem:[#allocation9 + $0x274] ss:$8 sps:$4 sm:$0xff]  }
 0x2e7   : > { %3082 = vmatpush1.bf16.msra.mxu0 %v5162_v26  ;;  %v5191_v26 = vld [vmem:[#allocation9 + $0xf4] ss:$8 sps:$4 sm:$0xff]  }
 0x2e8   : > { %3083 = vmatprep.subr.bf16.mxu0 %v5170_v29 }
 0x2eb   : > { %3084 = vmatpush1.bf16.msra.mxu0 %v5168_v28 }
 0x2ec   : > { %3085 = vmatprep.subr.bf16.mxu0 %v5176_v31 }
 0x2ef   : > { %3086 = vmatpush1.bf16.msra.mxu0 %v5174_v30 }
 0x2f0   : > { %3087 = vmatprep.subr.bf16.mxu0 %v5182_v19  ;;  %v5255_v19 = vld [vmem:[#allocation9 + $0x1c0] ss:$8 sps:$4 sm:$0xff]  }
 0x2f3   : > { %3088 = vmatpush1.bf16.msra.mxu0 %v5180_v20  ;;  %v5263_v20 = vld [vmem:[#allocation9 + $0x1b4] ss:$8 sps:$4 sm:$0xff]  }
 0x2f4   : > { %3089 = vmatprep.subr.bf16.mxu0 %v5188_v22  ;;  %v5261_v22 = vld [vmem:[#allocation9 + $0x1b0] ss:$8 sps:$4 sm:$0xff]  }
 0x2f7   : > { %3090 = vmatpush1.bf16.msra.mxu0 %v5186_v53  ;;  %v5269_v53 = vld [vmem:[#allocation9 + $0x1a4] ss:$8 sps:$4 sm:$0xff]  }
 0x2f8   : > { %3393 = vmatprep.subr.bf16.mxu0 %v5194_v27  ;;  %v5272_v27 = vld [vmem:[#allocation9 + $0x324] ss:$8 sps:$4 sm:$0xff]  }
 0x351   : > { %v2212_v34 = vpop.f32.mrf.mxu1 }
 0x353   : > { %v2214_v36 = vpop.f32.mrf.mxu1 }
 0x355   : > { %v2216_v38 = vpop.f32.mrf.mxu1 }
 0x357   : > { %v2218_v50 = vpop.f32.mrf.mxu1 }
 0x35a   : > { %v2009_v32 = vpop.f32.mrf.mxu0 }
 0x35b   : > { %v2213_v44 = vadd.f32 %v2212_v34, %v2009_v32  ;;  %v5189_v32 = vld [vmem:[#allocation9 + $0xf0] ss:$8 sps:$4 sm:$0xff]  }
 0x35c   : > { %v2011_v33 = vpop.f32.mrf.mxu0 }
 0x35d   : > { %v2215_v40 = vadd.f32 %v2214_v36, %v2011_v33  ;;  %v5192_v36 = vld [vmem:[#allocation9 + $0x270] ss:$8 sps:$4 sm:$0xff]  }
 0x35e   : > { %v2013_v35 = vpop.f32.mrf.mxu0 }
 0x35f   : > { %v2217_v46 = vadd.f32 %v2216_v38, %v2013_v35  ;;  %v5197_v35 = vld [vmem:[#allocation9 + $0xe4] ss:$8 sps:$4 sm:$0xff]  }
 0x360   : > { %v2015_v37 = vpop.f32.mrf.mxu0  ;;  %v5200_v38 = vld [vmem:[#allocation9 + $0x264] ss:$8 sps:$4 sm:$0xff]  }
 0x361   : > { %v2219_v54 = vadd.f32 %v2218_v50, %v2015_v37  ;;  %v5207_v50 = vld [vmem:[#allocation9 + $0xc0] ss:$8 sps:$4 sm:$0xff]  }
 0x39a   : > { %v2469_v39 = vpop.f32.mrf.mxu0 }
 0x39b   : > { %v2478_v56 = vadd.f32 %v2469_v39, %v2213_v44  ;;  %v5195_v39 = vld [vmem:[#allocation9 + $0xe0] ss:$8 sps:$4 sm:$0xff]   ;;  %v5201_v44 = vld [vmem:[#allocation9 + $0xd0] ss:$8 sps:$4 sm:$0xff]  }
 0x39c   : > { %v2471_v42 = vpop.f32.mrf.mxu0 }
 0x39d   : > { %v2479_v47 = vadd.f32 %v2471_v42, %v2215_v40  ;;  %v2494_v63 = vadd.f32 %v2487_v58, %v2478_v56  ;;  %v5203_v40 = vld [vmem:[#allocation9 + $0xd4] ss:$8 sps:$4 sm:$0xff]  }
 0x39e   : > { %v2473_v52 = vpop.f32.mrf.mxu0  ;;  %v5206_v42 = vld [vmem:[#allocation9 + $0x254] ss:$8 sps:$4 sm:$0xff]  }
 0x39f   : > { %v2480_v59 = vadd.f32 %v2473_v52, %v2217_v46  ;;  %v2495_v61 = vadd.f32 %v2491_v49, %v2479_v47  ;;  %v2498_v4 = vmax.f32 %v2494_v63, 0.0  ;;  %v5209_v46 = vld [vmem:[#allocation9 + $0xc4] ss:$8 sps:$4 sm:$0xff]   ;;  %v5204_v47 = vld [vmem:[#allocation9 + $0x250] ss:$8 sps:$4 sm:$0xff]  }
 0x3a0   : > { %v2475_v60 = vpop.f32.mrf.mxu0  ;;  %v5215_v52 = vld [vmem:[#allocation9 + $0xb4] ss:$8 sps:$4 sm:$0xff]   ;;  %v5222_v63 = vld [vmem:[#allocation9 + $0x220] ss:$8 sps:$4 sm:$0xff]  }
 0x3a1   : > { %v2496_v55 = vadd.f32 %v2487_v58, %v2480_v59  ;;  %v2481_v62 = vadd.f32 %v2475_v60, %v2219_v54  ;;  %v2499_v1 = vmax.f32 %v2495_v61, 0.0  ;;  %v5210_v54 = vld [vmem:[#allocation9 + $0x240] ss:$8 sps:$4 sm:$0xff]   ;;  %v5218_v56 = vld [vmem:[#allocation9 + $0x234] ss:$8 sps:$4 sm:$0xff]  }
 0x3a2   : > { %v5213_v58 = vld [vmem:[#allocation9 + $0xb0] ss:$8 sps:$4 sm:$0xff]   ;;  %v5221_v59 = vld [vmem:[#allocation9 + $0xa4] ss:$8 sps:$4 sm:$0xff]  }
 0x3a3   : > { %v2497_v51 = vadd.f32 %v2491_v49, %v2481_v62  ;;  %v2500_v2 = vmax.f32 %v2496_v55, 0.0  ;;  %v2502_v5 = vmax.f32 %v2498_v4, %v2499_v1  ;;  %v5212_v49 = vld [vmem:[#allocation9 + $0x244] ss:$8 sps:$4 sm:$0xff]   ;;  %v5216_v60 = vld [vmem:[#allocation9 + $0x230] ss:$8 sps:$4 sm:$0xff]  }
 0x3a4   : > { %v5224_v61 = vld [vmem:[#allocation9 + $0x224] ss:$8 sps:$4 sm:$0xff]   ;;  %v5219_v55 = vld [vmem:[#allocation9 + $0xa0] ss:$8 sps:$4 sm:$0xff]   ;;  %v5227_v62 = vld [vmem:[#allocation9 + $0x94] ss:$8 sps:$4 sm:$0xff]  }
 0x3a5   : > { %v2501_v3 = vmax.f32 %v2497_v51, 0.0  ;;  %v5230_v51 = vld [vmem:[#allocation9 + $0x214] ss:$8 sps:$4 sm:$0xff]   ;;  %v5225_v1 = vld [vmem:[#allocation9 + $0x90] ss:$8 sps:$4 sm:$0xff]  }
 0x3a6   : > { %v5236_v4 = vld [vmem:[#allocation9 + $0x204] ss:$8 sps:$4 sm:$0xff]  }
 0x3a7   : > { %v2503_v45 = vmax.f32 %v2500_v2, %v2501_v3  ;;  %v5233_v2 = vld [vmem:[#allocation9 + $0x84] ss:$8 sps:$4 sm:$0xff]   ;;  %v5228_v3 = vld [vmem:[#allocation9 + $0x210] ss:$8 sps:$4 sm:$0xff]  }
 0x3a9   : > { %4731 = vmatpush3.msra.mxu1 %v2503_v45 }
 0x3aa   : > { %4732 = vmatprep.subr.mxu1 %v6333_v43 }
 0x3ab   : > { %4733 = vmatpush3.msra.mxu1 %v2502_v5 }
 0x3ac   : > { %4735 = vmatmul.mubr.msk.f32.vlgmr.msra.gmra.mxu1 %vm2505_vm6, %v2504_v6  ;;  %4737 = vmatprep.subr.mxu1 %v6333_v43  ;;  %v5234_v6 = vld [vmem:[#allocation9 + $0x200] ss:$8 sps:$4 sm:$0xff]  }
 0x3ad   : > { %4738 = vmatpush3.msra.mxu1 %v2503_v45  ;;  %4741 = vmatprep.mubr.msk.f32.mxu1 %vm5595_vm5, %v6333_v43  ;;  %v5231_v45 = vld [vmem:[#allocation9 + $0x80] ss:$8 sps:$4 sm:$0xff]  }
 0x3ae   : > { %4739 = vmatprep.subr.mxu1 %v6333_v43  ;;  %v5165_v43 = vld [vmem:[#allocation9 + $0x30] ss:$8 sps:$4 sm:$0xff]  }
 0x3af   : > { %4740 = vmatpush3.msra.mxu1 %v2502_v5  ;;  %v5239_v5 = vld [vmem:[#allocation9 + $0x1f4] ss:$8 sps:$4 sm:$0xff]  }
 0x3b0   : > { %4742 = vmatmul.mubr.msk.f32.vlgmr.msra.gmra.mxu1 %vm2505_vm6, %v2580_v8  ;;  %2754 = vmatprep.subr.bf16.mxu1 %v5143_v7  ;;  %v5242_v7 = vld [vmem:[#allocation9 + $0x374] ss:$8 sps:$4 sm:$0xff]   ;;  %v5237_v8 = vld [vmem:[#allocation9 + $0x1f0] ss:$8 sps:$4 sm:$0xff]  }
 0x3b1   : > { %2755 = vmatpush1.bf16.msra.mxu1 %v5141_v21  ;;  %2786 = vmatprep.mubr.bf16.mxu1 %v6334_v18 }
 0x3b2   : > { %2756 = vmatprep.subr.bf16.mxu1 %v5149_v9  ;;  %v5245_v9 = vld [vmem:[#allocation9 + $0x1e4] ss:$8 sps:$4 sm:$0xff]  }
 0x3b5   : > { %2757 = vmatpush1.bf16.msra.mxu1 %v5147_v10  ;;  %v5240_v10 = vld [vmem:[#allocation9 + $0x370] ss:$8 sps:$4 sm:$0xff]  }
 0x3b6   : > { %2758 = vmatprep.subr.bf16.mxu1 %v5155_v11 }
 0x3b9   : > { %2759 = vmatpush1.bf16.msra.mxu1 %v5153_v12  ;;  %v5248_v12 = vld [vmem:[#allocation9 + $0x364] ss:$8 sps:$4 sm:$0xff]  }
 0x3ba   : > { %2760 = vmatprep.subr.bf16.mxu1 %v5161_v13  ;;  %v5243_v13 = vld [vmem:[#allocation9 + $0x1e0] ss:$8 sps:$4 sm:$0xff]  }
 0x3bd   : > { %2761 = vmatpush1.bf16.msra.mxu1 %v5159_v14  ;;  %v5251_v14 = vld [vmem:[#allocation9 + $0x1d4] ss:$8 sps:$4 sm:$0xff]  }
 0x3be   : > { %2762 = vmatprep.subr.bf16.mxu1 %v5167_v15  ;;  %v5246_v15 = vld [vmem:[#allocation9 + $0x360] ss:$8 sps:$4 sm:$0xff]  }
 0x3c1   : > { %2763 = vmatpush1.bf16.msra.mxu1 %v5165_v43  ;;  %v5254_v43 = vld [vmem:[#allocation9 + $0x354] ss:$8 sps:$4 sm:$0xff]  }
 0x3c2   : > { %2764 = vmatprep.subr.bf16.mxu1 %v5173_v16  ;;  %v5249_v16 = vld [vmem:[#allocation9 + $0x1d0] ss:$8 sps:$4 sm:$0xff]  }
 0x3c5   : > { %2765 = vmatpush1.bf16.msra.mxu1 %v5171_v23  ;;  %v5257_v23 = vld [vmem:[#allocation9 + $0x1c4] ss:$8 sps:$4 sm:$0xff]  }
 0x3c6   : > { %2766 = vmatprep.subr.bf16.mxu1 %v5179_v24  ;;  %v5252_v24 = vld [vmem:[#allocation9 + $0x350] ss:$8 sps:$4 sm:$0xff]  }
 0x3c9   : > { %2767 = vmatpush1.bf16.msra.mxu1 %v5177_v17  ;;  %v5260_v17 = vld [vmem:[#allocation9 + $0x344] ss:$8 sps:$4 sm:$0xff]  }
 0x3ca   : > { %2768 = vmatprep.subr.bf16.mxu1 %v5185_v25  ;;  %v5258_v25 = vld [vmem:[#allocation9 + $0x340] ss:$8 sps:$4 sm:$0xff]  }
 0x3cd   : > { %2769 = vmatpush1.bf16.msra.mxu1 %v5183_v0  ;;  %v5266_v0 = vld [vmem:[#allocation9 + $0x334] ss:$8 sps:$4 sm:$0xff]  }
 0x3ce   : > { %2915 = vmatprep.subr.bf16.mxu1 %v5191_v26  ;;  %v5264_v26 = vld [vmem:[#allocation9 + $0x330] ss:$8 sps:$4 sm:$0xff]  }
 0x46c   : > { %v2575_v28 = vpop.f32.mrf.mxu1 }
 0x46e   : > { %v4736_v29 = vpop.f32.mrf.mxu1 }
 0x46f   : > { %v5275_v29 = vld [vmem:[#allocation9 + $0x194] ss:$8 sps:$4 sm:$0xff]  }
 0x470   : > { %v2650_v30 = vpop.f32.mrf.mxu1 }
 0x471   : > { %v2654_v31 = vmax.f32 %v2575_v28, %v2650_v30  ;;  %v5267_v28 = vld [vmem:[#allocation9 + $0x1a0] ss:$8 sps:$4 sm:$0xff]  }
 0x472   : > { %v4743_v33 = vpop.f32.mrf.mxu1  ;;  %v5270_v30 = vld [vmem:[#allocation9 + $0x320] ss:$8 sps:$4 sm:$0xff]  }
 0x473   : > { %2655 = vst [vmem:[%s505_s16] sm:$0xff] %v2654_v31  ;;  %v6195_v34 = vpack.c.bf16 %v2654_v31, %v2654_v31  ;;  %v5278_v31 = vld [vmem:[#allocation9 + $0x314] ss:$8 sps:$4 sm:$0xff]   ;;  %v5281_v33 = vld [vmem:[#allocation9 + $0x184] ss:$8 sps:$4 sm:$0xff]  }
 0x475   : > { %2787 = vmatmul.mubr.bf16.vlgmr.msra.gmra.mxu1 %v6195_v34  ;;  %v2993_v37 = vrot.slane %v6195_v34, 1  ;;  %v6202_v21 = vshrl.u32 %v6195_v34, 16  ;;  %v3311_v11 = vrot.slane %v6195_v34, 2 }
 0x476   : > { %2916 = vmatpush1.bf16.msra.mxu1 %v5189_v32  ;;  %2947 = vmatprep.mubr.bf16.mxu1 %v6334_v18  ;;  %v5273_v32 = vld [vmem:[#allocation9 + $0x190] ss:$8 sps:$4 sm:$0xff]  }
 0x477   : > { %3108 = vmatmul.mubr.bf16.vlgmr.msra.gmra.mxu0 %v2993_v37  ;;  %2917 = vmatprep.subr.bf16.mxu1 %v5197_v35  ;;  %v5276_v35 = vld [vmem:[#allocation9 + $0x310] ss:$8 sps:$4 sm:$0xff]   ;;  %v5279_v37 = vld [vmem:[#allocation9 + $0x180] ss:$8 sps:$4 sm:$0xff]  }
 0x478   : > { %3394 = vmatpush1.bf16.msra.mxu0 %v5192_v36  ;;  %3425 = vmatprep.mubr.bf16.mxu0 %v6334_v18  ;;  %v5284_v36 = vld [vmem:[#allocation9 + $0x304] ss:$8 sps:$4 sm:$0xff]  }
 0x479   : > { %3395 = vmatprep.subr.bf16.mxu0 %v5200_v38  ;;  %v5287_v38 = vld [vmem:[#allocation9 + $0x2f4] ss:$8 sps:$4 sm:$0xff]  }
 0x47a   : > { %2918 = vmatpush1.bf16.msra.mxu1 %v5195_v39  ;;  %v5282_v39 = vld [vmem:[#allocation9 + $0x300] ss:$8 sps:$4 sm:$0xff]  }
 0x47b   : > { %2919 = vmatprep.subr.bf16.mxu1 %v5203_v40  ;;  %v5285_v40 = vld [vmem:[#allocation9 + $0x2f0] ss:$8 sps:$4 sm:$0xff]  }
 0x47c   : > { %3396 = vmatpush1.bf16.msra.mxu0 %v5198_v41  ;;  %v3152_v41 = vrot.slane %v6202_v21, 1 }
 0x47d   : > { %3397 = vmatprep.subr.bf16.mxu0 %v5206_v42  ;;  %v5290_v42 = vld [vmem:[#allocation9 + $0x2e4] ss:$8 sps:$4 sm:$0xff]  }
 0x47e   : > { %2920 = vmatpush1.bf16.msra.mxu1 %v5201_v44  ;;  %v3629_v44 = vrot.slane %v6195_v34, 3  ;;  %v5300_v34 = vld [vmem:[#allocation9 + $0x2a0] ss:$8 sps:$4 sm:$0xff]  }
 0x47f   : > { %2921 = vmatprep.subr.bf16.mxu1 %v5209_v46  ;;  %v5288_v46 = vld [vmem:[#allocation9 + $0x2e0] ss:$8 sps:$4 sm:$0xff]  }
 0x480   : > { %3398 = vmatpush1.bf16.msra.mxu0 %v5204_v47  ;;  %v5293_v47 = vld [vmem:[#allocation9 + $0x2d4] ss:$8 sps:$4 sm:$0xff]  }
 0x481   : > { %3399 = vmatprep.subr.bf16.mxu0 %v5212_v49  ;;  %v5291_v49 = vld [vmem:[#allocation9 + $0x2d0] ss:$8 sps:$4 sm:$0xff]  }
 0x482   : > { %2922 = vmatpush1.bf16.msra.mxu1 %v5207_v50  ;;  %v5296_v50 = vld [vmem:[#allocation9 + $0x2c4] ss:$8 sps:$4 sm:$0xff]  }
 0x483   : > { %2923 = vmatprep.subr.bf16.mxu1 %v5215_v52  ;;  %v5294_v52 = vld [vmem:[#allocation9 + $0x2c0] ss:$8 sps:$4 sm:$0xff]  }
 0x484   : > { %3400 = vmatpush1.bf16.msra.mxu0 %v5210_v54  ;;  %v5299_v54 = vld [vmem:[#allocation9 + $0x2b4] ss:$8 sps:$4 sm:$0xff]  }
 0x485   : > { %3401 = vmatprep.subr.bf16.mxu0 %v5218_v56  ;;  %v5297_v56 = vld [vmem:[#allocation9 + $0x2b0] ss:$8 sps:$4 sm:$0xff]  }
 0x486   : > { %2924 = vmatpush1.bf16.msra.mxu1 %v5213_v58  ;;  %v5302_v58 = vld [vmem:[#allocation9 + $0x2a4] ss:$8 sps:$4 sm:$0xff]  }
 0x487   : > { %2925 = vmatprep.subr.bf16.mxu1 %v5221_v59  ;;  %v5305_v59 = vld [vmem:[#allocation9 + $0x294] ss:$8 sps:$4 sm:$0xff]  }
 0x488   : > { %3402 = vmatpush1.bf16.msra.mxu0 %v5216_v60  ;;  %v5303_v60 = vld [vmem:[#allocation9 + $0x290] ss:$8 sps:$4 sm:$0xff]  }
 0x489   : > { %3403 = vmatprep.subr.bf16.mxu0 %v5224_v61  ;;  %v5308_v61 = vld [vmem:[#allocation9 + $0x284] ss:$8 sps:$4 sm:$0xff]  }
 0x48a   : > { %2926 = vmatpush1.bf16.msra.mxu1 %v5219_v55  ;;  %v5306_v55 = vld [vmem:[#allocation9 + $0x280] ss:$8 sps:$4 sm:$0xff]  }
 0x48b   : > { %2927 = vmatprep.subr.bf16.mxu1 %v5227_v62  ;;  %v5311_v62 = vld [vmem:[#allocation9 + $0x3f4] ss:$8 sps:$4 sm:$0xff]  }
 0x48c   : > { %3404 = vmatpush1.bf16.msra.mxu0 %v5222_v63  ;;  %v5309_v63 = vld [vmem:[#allocation9 + $0x3f0] ss:$8 sps:$4 sm:$0xff]  }
 0x48d   : > { %3405 = vmatprep.subr.bf16.mxu0 %v5230_v51  ;;  %v3470_v51 = vrot.slane %v6202_v21, 2 }
 0x48e   : > { %2928 = vmatpush1.bf16.msra.mxu1 %v5225_v1  ;;  %v5314_v1 = vld [vmem:[#allocation9 + $0x3e4] ss:$8 sps:$4 sm:$0xff]  }
 0x48f   : > { %2929 = vmatprep.subr.bf16.mxu1 %v5233_v2  ;;  %v5312_v2 = vld [vmem:[#allocation9 + $0x3e0] ss:$8 sps:$4 sm:$0xff]  }
 0x490   : > { %3406 = vmatpush1.bf16.msra.mxu0 %v5228_v3  ;;  %v5317_v3 = vld [vmem:[#allocation9 + $0x3d4] ss:$8 sps:$4 sm:$0xff]  }
 0x491   : > { %3407 = vmatprep.subr.bf16.mxu0 %v5236_v4  ;;  %v5315_v4 = vld [vmem:[#allocation9 + $0x3d0] ss:$8 sps:$4 sm:$0xff]  }
 0x492   : > { %2930 = vmatpush1.bf16.msra.mxu1 %v5231_v45  ;;  %v5320_v45 = vld [vmem:[#allocation9 + $0x3c4] ss:$8 sps:$4 sm:$0xff]  }
 0x493   : > { %3234 = vmatprep.subr.bf16.mxu1 %v5239_v5  ;;  %v5318_v5 = vld [vmem:[#allocation9 + $0x3c0] ss:$8 sps:$4 sm:$0xff]  }
 0x494   : > { %3408 = vmatpush1.bf16.msra.mxu0 %v5234_v6  ;;  %v5323_v6 = vld [vmem:[#allocation9 + $0x3b4] ss:$8 sps:$4 sm:$0xff]  }
 0x495   : > { %2948 = vmatmul.mubr.bf16.vlgmr.msra.gmra.mxu1 %v6202_v21  ;;  %3711 = vmatprep.subr.bf16.mxu0 %v5242_v7  ;;  %v5321_v7 = vld [vmem:[#allocation9 + $0x3b0] ss:$8 sps:$4 sm:$0xff]  }
 0x496   : > { %3235 = vmatpush1.bf16.msra.mxu1 %v5237_v8  ;;  %3266 = vmatprep.mubr.bf16.mxu1 %v6334_v18  ;;  %v5326_v8 = vld [vmem:[#allocation9 + $0x3a4] ss:$8 sps:$4 sm:$0xff]  }
 0x497   : > { %3426 = vmatmul.mubr.bf16.vlgmr.msra.gmra.mxu0 %v3311_v11  ;;  %3236 = vmatprep.subr.bf16.mxu1 %v5245_v9  ;;  %v5324_v9 = vld [vmem:[#allocation9 + $0x3a0] ss:$8 sps:$4 sm:$0xff]   ;;  %v5332_v11 = vld [vmem:[#allocation9 + $0x384] ss:$8 sps:$4 sm:$0xff]  }
 0x498   : > { %3712 = vmatpush1.bf16.msra.mxu0 %v5240_v10  ;;  %3743 = vmatprep.mubr.bf16.mxu0 %v6334_v18  ;;  %v5329_v10 = vld [vmem:[#allocation9 + $0x394] ss:$8 sps:$4 sm:$0xff]  }
 0x499   : > { %3713 = vmatprep.subr.bf16.mxu0 %v5248_v12  ;;  %v5330_v12 = vld [vmem:[#allocation9 + $0x380] ss:$8 sps:$4 sm:$0xff]  }
 0x49a   : > { %3237 = vmatpush1.bf16.msra.mxu1 %v5243_v13  ;;  %v3788_v13 = vrot.slane %v6202_v21, 3 }
 0x49b   : > { %3238 = vmatprep.subr.bf16.mxu1 %v5251_v14  ;;  %v5333_v14 = vld [vmem:[#allocation12 + $0x78] sm:$0xff]  }
 0x49c   : > { %3714 = vmatpush1.bf16.msra.mxu0 %v5246_v15  ;;  %v5334_v15 = vld [vmem:[#allocation12 + $0x38] sm:$0xff]  }
 0x49d   : > { %3715 = vmatprep.subr.bf16.mxu0 %v5254_v43  ;;  %v5335_v43 = vld [vmem:[#allocation12 + $0x70] sm:$0xff]  }
 0x49e   : > { %3239 = vmatpush1.bf16.msra.mxu1 %v5249_v16  ;;  %v5336_v16 = vld [vmem:[#allocation12 + $0x30] sm:$0xff]  }
 0x49f   : > { %3240 = vmatprep.subr.bf16.mxu1 %v5257_v23  ;;  %v5337_v23 = vld [vmem:[#allocation12 + $0x68] sm:$0xff]  }
 0x4a0   : > { %3716 = vmatpush1.bf16.msra.mxu0 %v5252_v24  ;;  %v5338_v24 = vld [vmem:[#allocation12 + $0x28] sm:$0xff]  }
 0x4a1   : > { %3717 = vmatprep.subr.bf16.mxu0 %v5260_v17  ;;  %v5339_v17 = vld [vmem:[#allocation12 + $0x60] sm:$0xff]  }
 0x4a2   : > { %3241 = vmatpush1.bf16.msra.mxu1 %v5255_v19  ;;  %v5340_v19 = vld [vmem:[#allocation12 + $0x20] sm:$0xff]  }
 0x4a3   : > { %3242 = vmatprep.subr.bf16.mxu1 %v5263_v20  ;;  %v5596_v20 = vmov 1966171168  }
 0x4a4   : > { %3718 = vmatpush1.bf16.msra.mxu0 %v5258_v25  ;;  %v2799_v25 = vunpack.c.l.s4 %v5596_v20 }
 0x4a5   : > { %3719 = vmatprep.subr.bf16.mxu0 %v5266_v0 }
 0x4a6   : > { %3243 = vmatpush1.bf16.msra.mxu1 %v5261_v22  ;;  %v2800_v21 = vunpack.c.0.s8 %v2799_v25  ;;  %v5341_v22 = vld [vmem:[#allocation12 + $0x58] sm:$0xff]  }
 0x4a7   : > { %3244 = vmatprep.subr.bf16.mxu1 %v5269_v53  ;;  %v6337_v53 = vld [vmem:[#allocation23_spill] sm:$0xff] }
 0x4a8   : > { %3720 = vmatpush1.bf16.msra.mxu0 %v5264_v26  ;;  %v6215_v26 = vsub.s32 %v2800_v21, %v6337_v53 }
 0x4a9   : > { %3721 = vmatprep.subr.bf16.mxu0 %v5272_v27  ;;  %v5342_v27 = vld [vmem:[#allocation12 + $0x18] sm:$0xff]  }
 0x4aa   : > { %3245 = vmatpush1.bf16.msra.mxu1 %v5267_v28 }
 0x4ab   : > { %3246 = vmatprep.subr.bf16.mxu1 %v5275_v29 }
 0x4ac   : > { %3722 = vmatpush1.bf16.msra.mxu0 %v5270_v30 }
 0x4ad   : > { %3723 = vmatprep.subr.bf16.mxu0 %v5278_v31 }
 0x4ae   : > { %3247 = vmatpush1.bf16.msra.mxu1 %v5273_v32 }
 0x4af   : > { %3248 = vmatprep.subr.bf16.mxu1 %v5281_v33  ;;  %v5343_v33 = vld [vmem:[#allocation12 + $0x50] sm:$0xff]  }
 0x4b0   : > { %3724 = vmatpush1.bf16.msra.mxu0 %v5276_v35 }
 0x4b1   : > { %3725 = vmatprep.subr.bf16.mxu0 %v5284_v36 }
 0x4b2   : > { %3249 = vmatpush1.bf16.msra.mxu1 %v5279_v37  ;;  %v5344_v37 = vld [vmem:[#allocation12 + $0x10] sm:$0xff]  }
 0x4b3   : > { %3552 = vmatprep.subr.bf16.mxu1 %v5287_v38 }
 0x4b4   : > { %3726 = vmatpush1.bf16.msra.mxu0 %v5282_v39 }
 0x4b5   : > { %3267 = vmatmul.mubr.bf16.vlgmr.msra.gmra.mxu1 %v3152_v41  ;;  %4708 = vmatprep.subr.bf16.mxu0 %v5333_v14 }
 0x4b6   : > { %3553 = vmatpush1.bf16.msra.mxu1 %v5285_v40  ;;  %3584 = vmatprep.mubr.bf16.mxu1 %v6334_v18 }
 0x4b7   : > { %3744 = vmatmul.mubr.bf16.vlgmr.msra.gmra.mxu0 %v3629_v44  ;;  %3554 = vmatprep.subr.bf16.mxu1 %v5290_v42  ;;  %v5345_v44 = vld [vmem:[#allocation12 + $0x48] sm:$0xff]  }
 0x4b8   : > { %4709 = vmatpush3.bf16.msra.mxu0 %v5334_v15 }
 0x4b9   : > { %4710 = vmatprep.subr.bf16.mxu0 %v5335_v43 }
 0x4ba   : > { %3555 = vmatpush1.bf16.msra.mxu1 %v5288_v46 }
 0x4bb   : > { %3556 = vmatprep.subr.bf16.mxu1 %v5293_v47  ;;  %v5346_v47 = vld [vmem:[#allocation12 + $0x8] sm:$0xff]  }
 0x4bc   : > { %4711 = vmatpush3.bf16.msra.mxu0 %v5336_v16 }
 0x4bd   : > { %4712 = vmatprep.subr.bf16.mxu0 %v5337_v23 }
 0x4be   : > { %3557 = vmatpush1.bf16.msra.mxu1 %v5291_v49  ;;  %v5347_v49 = vld [vmem:[#allocation12 + $0x40] sm:$0xff]  }
 0x4bf   : > { %3558 = vmatprep.subr.bf16.mxu1 %v5296_v50  ;;  %v5348_v50 = vld [vmem:[#allocation12] sm:$0xff]  }
 0x4c0   : > { %4713 = vmatpush3.bf16.msra.mxu0 %v5338_v24 }
 0x4c1   : > { %4714 = vmatprep.subr.bf16.mxu0 %v5339_v17 }
 0x4c2   : > { %3559 = vmatpush1.bf16.msra.mxu1 %v5294_v52 }
 0x4c3   : > { %3560 = vmatprep.subr.bf16.mxu1 %v5299_v54 }
 0x4c4   : > { %4715 = vmatpush3.bf16.msra.mxu0 %v5340_v19 }
 0x4c5   : > { %4716 = vmatprep.subr.bf16.mxu0 %v5341_v22 }
 0x4c6   : > { %3561 = vmatpush1.bf16.msra.mxu1 %v5297_v56 }
 0x4c7   : > { %3562 = vmatprep.subr.bf16.mxu1 %v5302_v58 }
 0x4c8   : > { %4717 = vmatpush3.bf16.msra.mxu0 %v5342_v27 }
 0x4c9   : > { %4718 = vmatprep.subr.bf16.mxu0 %v5343_v33 }
 0x4ca   : > { %3563 = vmatpush1.bf16.msra.mxu1 %v5300_v34  ;;  %v2656_v34 = vld [vmem:[#allocation11] sm:$0x3] }
 0x4cb   : > { %3564 = vmatprep.subr.bf16.mxu1 %v5305_v59 }
 0x4cc   : > { %4719 = vmatpush3.bf16.msra.mxu0 %v5344_v37 }
 0x4cd   : > { %4720 = vmatprep.subr.bf16.mxu0 %v5345_v44 }
 0x4ce   : > { %3565 = vmatpush1.bf16.msra.mxu1 %v5303_v60 }
 0x4cf   : > { %3566 = vmatprep.subr.bf16.mxu1 %v5308_v61 }
 0x4d0   : > { %4721 = vmatpush3.bf16.msra.mxu0 %v5346_v47 }
 0x4d1   : > { %4722 = vmatprep.subr.bf16.mxu0 %v5347_v49 }
 0x4d2   : > { %3567 = vmatpush1.bf16.msra.mxu1 %v5306_v55 }
 0x4d3   : > { %3870 = vmatprep.subr.bf16.mxu1 %v5311_v62 }
 0x4d4   : > { %4723 = vmatpush3.bf16.msra.mxu0 %v5348_v50 }
 0x4d5   : > { %3585 = vmatmul.mubr.bf16.vlgmr.msra.gmra.mxu1 %v3470_v51 }
 0x4d6   : > { %3871 = vmatpush1.bf16.msra.mxu1 %v5309_v63  ;;  %3902 = vmatprep.mubr.bf16.mxu1 %v6334_v18  ;;  %v5327_v18 = vld [vmem:[#allocation9 + $0x390] ss:$8 sps:$4 sm:$0xff]  }
 0x4d7   : > { %3872 = vmatprep.subr.bf16.mxu1 %v5314_v1 }
 0x4da   : > { %3873 = vmatpush1.bf16.msra.mxu1 %v5312_v2 }
 0x4db   : > { %3874 = vmatprep.subr.bf16.mxu1 %v5317_v3 }
 0x4de   : > { %3875 = vmatpush1.bf16.msra.mxu1 %v5315_v4 }
 0x4df   : > { %3876 = vmatprep.subr.bf16.mxu1 %v5320_v45 }
 0x4e2   : > { %3877 = vmatpush1.bf16.msra.mxu1 %v5318_v5 }
 0x4e3   : > { %3878 = vmatprep.subr.bf16.mxu1 %v5323_v6 }
 0x4e6   : > { %3879 = vmatpush1.bf16.msra.mxu1 %v5321_v7 }
 0x4e7   : > { %3880 = vmatprep.subr.bf16.mxu1 %v5326_v8 }
 0x4ea   : > { %3881 = vmatpush1.bf16.msra.mxu1 %v5324_v9 }
 0x4eb   : > { %3882 = vmatprep.subr.bf16.mxu1 %v5329_v10 }
 0x4ee   : > { %3883 = vmatpush1.bf16.msra.mxu1 %v5327_v18 }
 0x4ef   : > { %3884 = vmatprep.subr.bf16.mxu1 %v5332_v11 }
 0x4f2   : > { %3885 = vmatpush1.bf16.msra.mxu1 %v5330_v12 }
 0x4f5   : > { %3903 = vmatmul.mubr.bf16.vlgmr.msra.gmra.mxu1 %v3788_v13 }
 0x535   : > { %v2788_v0 = vpop.f32.mrf.mxu1 }
 0x537   : > { %v2790_v28 = vpop.f32.mrf.mxu1  ;;  %v3109_v29 = vpop.f32.mrf.mxu0 }
 0x538   : > { %v2797_v30 = vcombine.low %v2788_v0, %v2790_v28 }
 0x539   : > { %v2792_v31 = vpop.f32.mrf.mxu1  ;;  %v3111_v32 = vpop.f32.mrf.mxu0 }
 0x53a   : > { %v2804_v35 = vrot.slane %v2797_v30, %v6215_v26  ;;  %v3118_v36 = vcombine.low %v3109_v29, %v3111_v32 }
 0x53b   : > { %v2793_v38 = vpop.f32.mrf.mxu1  ;;  %v3113_v39 = vpop.f32.mrf.mxu0 }
 0x53c   : > { %v2811_v40 = vrot.slane %v2804_v35, %v6215_v26  ;;  %v3125_v41 = vrot.slane %v3118_v36, %v6215_v26 }
 0x53d   : > { %v3114_v42 = vpop.f32.mrf.mxu0 }
 0x53e   : > { %v3132_v46 = vrot.slane %v3125_v41, %v6215_v26  ;;  %v2813_v51 = vadd.f32 %v2811_v40, %v2656_v34 }
 0x555   : > { %v2949_v52 = vpop.f32.mrf.mxu1 }
 0x557   : > { %v2951_v54 = vpop.f32.mrf.mxu1  ;;  %v3427_v56 = vpop.f32.mrf.mxu0 }
 0x558   : > { %v2958_v58 = vcombine.low %v2949_v52, %v2951_v54 }
 0x559   : > { %v2953_v59 = vpop.f32.mrf.mxu1  ;;  %v3429_v60 = vpop.f32.mrf.mxu0 }
 0x55a   : > { %v2965_v61 = vrot.slane %v2958_v58, %v6215_v26  ;;  %v3436_v55 = vcombine.low %v3427_v56, %v3429_v60 }
 0x55b   : > { %v2954_v62 = vpop.f32.mrf.mxu1  ;;  %v3431_v63 = vpop.f32.mrf.mxu0 }
 0x55c   : > { %v2972_v1 = vrot.slane %v2965_v61, %v6215_v26  ;;  %v3443_v2 = vrot.slane %v3436_v55, %v6215_v26 }
 0x55d   : > { %v3432_v3 = vpop.f32.mrf.mxu0 }
 0x55e   : > { %v2974_v4 = vadd.f32 %v2972_v1, %v2813_v51  ;;  %v3450_v45 = vrot.slane %v3443_v2, %v6215_v26 }
 0x560   : > { %v3134_v5 = vadd.f32 %v3132_v46, %v2974_v4  ;;  %v3976_v46 = vld [vmem:[%s6288_s10] sm:$0x1] }
 0x575   : > { %v3268_v6 = vpop.f32.mrf.mxu1 }
 0x577   : > { %v3270_v7 = vpop.f32.mrf.mxu1  ;;  %v3745_v8 = vpop.f32.mrf.mxu0 }
 0x578   : > { %v3277_v9 = vcombine.low %v3268_v6, %v3270_v7 }
 0x579   : > { %v3272_v10 = vpop.f32.mrf.mxu1  ;;  %v3747_v18 = vpop.f32.mrf.mxu0 }
 0x57a   : > { %v3284_v11 = vrot.slane %v3277_v9, %v6215_v26  ;;  %v3754_v24 = vcombine.low %v3745_v8, %v3747_v18 }
 0x57b   : > { %v3273_v12 = vpop.f32.mrf.mxu1  ;;  %v3749_v13 = vpop.f32.mrf.mxu0 }
 0x57c   : > { %v3291_v14 = vrot.slane %v3284_v11, %v6215_v26  ;;  %v3761_v25 = vrot.slane %v3754_v24, %v6215_v26 }
 0x57d   : > { %v3750_v15 = vpop.f32.mrf.mxu0 }
 0x57e   : > { %v3293_v43 = vadd.f32 %v3291_v14, %v3134_v5  ;;  %v3768_v53 = vrot.slane %v3761_v25, %v6215_v26 }
 0x580   : > { %v3452_v16 = vadd.f32 %v3450_v45, %v3293_v43 }
 0x595   : > { %v3586_v23 = vpop.f32.mrf.mxu1 }
 0x597   : > { %v3588_v17 = vpop.f32.mrf.mxu1 }
 0x598   : > { %v3595_v19 = vcombine.low %v3586_v23, %v3588_v17 }
 0x599   : > { %v3590_v20 = vpop.f32.mrf.mxu1 }
 0x59a   : > { %v3602_v21 = vrot.slane %v3595_v19, %v6215_v26 }
 0x59b   : > { %v3591_v0 = vpop.f32.mrf.mxu1 }
 0x59c   : > { %v3609_v22 = vrot.slane %v3602_v21, %v6215_v26 }
 0x59e   : > { %v3611_v27 = vadd.f32 %v3609_v22, %v3452_v16 }
 0x5a0   : > { %v3770_v28 = vadd.f32 %v3768_v53, %v3611_v27 }
 0x5b5   : > { %v3904_v29 = vpop.f32.mrf.mxu1 }
 0x5b7   : > { %v3906_v30 = vpop.f32.mrf.mxu1 }
 0x5b8   : > { %v3913_v31 = vcombine.low %v3904_v29, %v3906_v30 }
 0x5b9   : > { %v3908_v32 = vpop.f32.mrf.mxu1 }
 0x5ba   : > { %v3920_v33 = vrot.slane %v3913_v31, %v6215_v26 }
 0x5bb   : > { %v3909_v35 = vpop.f32.mrf.mxu1 }
 0x5bc   : > { %v3927_v36 = vrot.slane %v3920_v33, %v6215_v26 }
 0x5be   : > { %v3929_v37 = vadd.f32 %v3927_v36, %v3770_v28 }
 0x5c0   : > { %v3930_v38 = vmax.f32 %v3929_v37, 0.0 }
 0x5c2   : > { %v3939_v39 = vrot.slane %v3930_v38, %v6335_v48  ;;  %v3935_v40 = vrot.slane %v3930_v38, %v6336_v57 }
 0x5c4   : > { %v3943_v41 = vpack.c.bf16 %v3939_v39, %v3939_v39  ;;  %v3942_v42 = vpack.c.bf16 %v3935_v40, %v3935_v40 }
 0x5c6   : > { %4105 = vmatprep.mubr.bf16.mxu0 %v3943_v41 }
 0x5c7   : > { %4106 = vmatmul.mubr.bf16.vlgmr.msra.gmra.mxu0 %v3942_v42 }
 0x687   : > { %v4724_v44 = vpop.f32.mrf.mxu0 }
 0x689   : > { %v4725_v47 = vpop.f32.mrf.mxu0 }
 0x68a   : > { %v4726_v26 = vadd.f32 %v4725_v47, %v4724_v44 }
 0x68b   : > { %v4727_v49 = vpop.f32.mrf.mxu0 }
 0x68c   : > { %v4108_v48 = vadd.f32 %v4726_v26, %v3976_v46 }
 0x68d   : > { %v4728_v57 = vpop.f32.mrf.mxu0 }
 0x68e   : > { %4113 = vst [vmem:[%s496_s7] sm:$0x1] %v4108_v48 }
 0x68f   : > { %5518 = shalt.err (!%p5515_p4)
}
 0x690   : > { %s5519_s16 = scalar_lea.hbm %s6243_s26, 16  ;;  %s5523_s5 = scalar_lea.hbm %s6290_s12, 32 }
 0x691   : > { %p5520_p7 = scmp.ne.s32.totalorder %s6243_s26, %s5519_s16  ;;  %p5524_p11 = scmp.lt.s32.totalorder %s6243_s26, %s6290_s12 }
 0x692   : > { %p5525_p0 = scmp.lt.s32.totalorder %s5523_s5, %s5519_s16 }
 0x693   : > { %p5521_p8 = pnand %p5520_p7, %p6338_p2 }
 0x694   : > { %p5526_p1 = por %p5525_p0, %p5524_p11 }
 0x695   : > { %p5522_p12 = pneg %p5521_p8 }
 0x697   : > { %p5527_p9 = pnand %p5526_p1, %p5522_p12 }
 0x699   : > { %5530 = shalt.err (!%p5527_p9)
}
 0x69a   : > { %4769 = dma.vmem_to_hbm [thread:$0]  (%p6338_p2), %s4135_s15, 16, %s6243_s26, %s4119_s27  }
 0x69b PF: > { %p4806_p5 = scmp.ge.s32.totalorder %s5581_s24, 2  ;;  %s4153_s29 = sand.u32 1, %s5569_s21  }
 0x69c   : > { %p6339_p6 = scmp.ne.s32.totalorder %s6313_s14, 0  ;;  %s4154_s17 = scalar_lea.sflag [#allocation5], %s4153_s29 }
 0x69e   : > { %p4791_p10 = pnand %p4806_p5, %p6339_p6 }
 0x6a0   : > { %p4792_p3 = pneg %p4791_p10 }
 0x6a2   : > { %5564 = dma.done.wait (%p4792_p3), %s4154_s17, 16  }
 0x6a3   : > { %5566 = vsyncadd (%p4792_p3), %s4154_s17, 4294967280  ;;  %s6340_s24 = sld [smem:[#allocation21_spill]]  ;;  %s6343_s21 = smov %s5573_s22 }
 0x6a4   : > { %s6341_s30 = sld [smem:[#allocation20_spill]] }
 0x6a5   : > { %s6342_s23 = sld [smem:[#allocation22_spill]] }
 0x6a9   : > { %p27_p13 = scmp.ge.s32.totalorder %s6340_s24, 4  }
 0x6aa   : > { %s6344_s22 = smov %s6341_s30 }
 0x6ab   :  { %29 = sbr.rel (!%p27_p13) target bundleno = 10 (0xa), region = 150 }
 0x6b0   :  { %4158 = vsyncpa [#allocation4], 1 }
 0x6b1   :  { %4160 = vsyncpa [#allocation4 + $0x1], 1 }
 0x6b2   :  { %4161 = vsyncpa [#allocation7], 1 }
 0x6b3   :  { %4162 = vsyncpa [#allocation10], 1 }
 0x6b4   :  { %4163 = vsyncpa [#allocation13], 1 }
 0x6b5   :  { %4164 = vsyncpa [#allocation5], 1 }
 0x6b6   :  { %4166 = vsyncpa [#allocation5 + $0x1], 1 }

</bundles_post_ra>
